<compile_context>
chip_gen: v6e
topology: v6e:2x2x1
jax: 0.10.0
libtpu: 0.0.40
codegen_flags: <defaults>
</compile_context>

<pallas_src>
import functools

import jax
import jax.numpy as jnp
from jax import lax
from jax.experimental import pallas as pl
from jax.experimental.pallas import tpu as pltpu

EPS = 1e-5   # BatchNorm2d default eps


def _round_up(x, m):
    return ((x + m - 1) // m) * m


def _pick_tile(n, cap=512):
    """Largest of {512, 256, 128} <= cap that divides n (n is 128-padded)."""
    for t in (512, 256, 128):
        if t <= cap and n % t == 0:
            return t
    return 128


def _vmem_limit_bytes():
    """Generation-aware scoped-VMEM limit (v7x has only 64 MiB physical)."""
    try:
        kind = jax.devices()[0].device_kind.lower()
    except Exception:  # pragma: no cover - defensive
        kind = ""
    if "7" in kind:                   # v7x
        return 48 * 1024 * 1024
    return 64 * 1024 * 1024           # v5e / v6e (128 MiB physical)


# ---------------------------------------------------------------------------
# Kernel 1: fused 1x1conv+BN projections  x -> fself ;  y -> fy   (bf16)
#   Output is interleaved [fy | fself] along the channel axis so kernel 2
#   needs a single DMA per KV tile.
# ---------------------------------------------------------------------------
def _proj_kernel(x_ref, y_ref, wself_ref, bself_ref, wy_ref, by_ref,
                 kv_ref, *, midp):
    x = x_ref[0]                                           # (tn, Cxp) bf16
    y = y_ref[0]                                           # (tn, Cyp) bf16

    fself = jnp.dot(x, wself_ref[...],
                    preferred_element_type=jnp.float32) + bself_ref[...]
    fy = jnp.dot(y, wy_ref[...],
                 preferred_element_type=jnp.float32) + by_ref[...]

    kv_ref[0, :, :midp] = fy.astype(jnp.bfloat16)          # lane-aligned halves
    kv_ref[0, :, midp:] = fself.astype(jnp.bfloat16)


# ---------------------------------------------------------------------------
# Kernel 2: fx projection (once per q tile) + flash-style cross-attention
#           + f_up + residual.   grid = (B, q_tiles, kv_tiles), KV innermost.
# ---------------------------------------------------------------------------
def _attn_kernel(xq_ref, kv_ref, wx_ref, bx_ref, wup_ref, bup_ref,
                 o_ref, m_sc, l_sc, acc_sc, fx_sc,
                 *, midp, n_valid, n_padded):
    ki = pl.program_id(2)

    @pl.when(ki == 0)
    def _init():
        m_sc[...] = jnp.full(m_sc.shape, -jnp.inf, jnp.float32)
        l_sc[...] = jnp.zeros(l_sc.shape, jnp.float32)
        acc_sc[...] = jnp.zeros(acc_sc.shape, jnp.float32)
        # fx projection computed once per (b, q) tile from the resident x tile
        # (scale already folded into W_x / b_x in the wrapper).
        xq = xq_ref[0].astype(jnp.bfloat16)                         # (tq, Cxp)
        fx = jnp.dot(xq, wx_ref[...],
                     preferred_element_type=jnp.float32) + bx_ref[...]
        fx_sc[...] = fx.astype(jnp.bfloat16)                        # (tq, midp)

    fy = kv_ref[0, :, :midp]                                        # (tk, midp) bf16
    fself = kv_ref[0, :, midp:]                                     # (tk, midp) bf16

    # sim tile on the MXU; contract the mid axis of both operands directly
    # (no materialized transpose of fy).
    s = lax.dot_general(fx_sc[...], fy,
                        dimension_numbers=(((1,), (1,)), ((), ())),
                        preferred_element_type=jnp.float32)         # (tq, tk) f32

    if n_padded != n_valid:
        # Mask padded KV columns to -inf before the softmax exp.
        tk = s.shape[1]
        col = ki * tk + lax.broadcasted_iota(jnp.int32, s.shape, 1)
        s = jnp.where(col < n_valid, s, -jnp.inf)

    m_prev = m_sc[...]                                              # (tq, 1)
    m_new = jnp.maximum(m_prev, jnp.max(s, axis=-1, keepdims=True))
    alpha = jnp.exp(m_prev - m_new)                                 # f32
    p = jnp.exp(s - m_new)                                          # (tq, tk) f32

    l_sc[...] = alpha * l_sc[...] + jnp.sum(p, axis=-1, keepdims=True)
    acc_sc[...] = alpha * acc_sc[...] + jnp.dot(
        p.astype(jnp.bfloat16), fself,
        preferred_element_type=jnp.float32)                         # (tq, midp) f32
    m_sc[...] = m_new

    @pl.when(ki == pl.num_programs(2) - 1)
    def _finalize():
        fout = acc_sc[...] * pl.reciprocal(l_sc[...], approx=True)  # (tq, midp)
        up = jnp.dot(fout.astype(jnp.bfloat16), wup_ref[...],
                     preferred_element_type=jnp.float32) + bup_ref[...]
        o_ref[0] = xq_ref[0] + up                                   # residual


# ---------------------------------------------------------------------------
# Wrapper: padding, scale folding, bf16 casts, two pallas_calls.
# ---------------------------------------------------------------------------
def bca_pallas(x_flat, y_flat, params, *, scale, mid_channels):
    """x_flat: (B, N, Cx) f32, y_flat: (B, N, Cy) f32  ->  (B, N, Cx) f32."""
    B, N, Cx = x_flat.shape
    _, Ny, Cy = y_flat.shape
    assert Ny == N, "BCA requires Hy*Wy == H*W"
    mid = mid_channels

    W_self, b_self, W_x, b_x, W_y, b_y, W_up, b_up = params

    # Fold the attention scale into the query projection (zero runtime cost).
    if scale:
        sc = mid ** (-0.5)
        W_x = W_x * sc
        b_x = b_x * sc

    Cxp = _round_up(Cx, 128)
    Cyp = _round_up(Cy, 128)
    midp = _round_up(mid, 128)
    Np = _round_up(N, 128)          # padded spatial extent (tiling-safe)

    def pad2(a, r, c):
        return jnp.pad(a, ((0, r - a.shape[0]), (0, c - a.shape[1])))

    wx = pad2(W_x, Cxp, midp).astype(jnp.bfloat16)
    wself = pad2(W_self, Cxp, midp).astype(jnp.bfloat16)
    wy = pad2(W_y, Cyp, midp).astype(jnp.bfloat16)
    wup = pad2(W_up, midp, Cxp).astype(jnp.bfloat16)
    bx = pad2(b_x, 1, midp).astype(jnp.float32)
    bself = pad2(b_self, 1, midp).astype(jnp.float32)
    by = pad2(b_y, 1, midp).astype(jnp.float32)
    bup = pad2(b_up, 1, Cxp).astype(jnp.float32)

    def pad3(a, n, c):
        return jnp.pad(a, ((0, 0), (0, n - a.shape[1]), (0, c - a.shape[2])))

    # f32 x kept only for the residual / fx source in kernel 2; kernel 1 reads
    # bf16 x/y (cast fused into the same pad/copy pass).
    xq = pad3(x_flat, Np, Cxp)
    x_bf = pad3(x_flat.astype(jnp.bfloat16), Np, Cxp)
    y_bf = pad3(y_flat.astype(jnp.bfloat16), Np, Cyp)

    vmem = _vmem_limit_bytes()

    # ---- kernel 1: fself / fy projections (interleaved bf16 output) -------
    tn = _pick_tile(Np, cap=512)
    kv = pl.pallas_call(
        functools.partial(_proj_kernel, midp=midp),
        out_shape=jax.ShapeDtypeStruct((B, Np, 2 * midp), jnp.bfloat16),
        grid_spec=pltpu.PrefetchScalarGridSpec(
            num_scalar_prefetch=0,
            grid=(B, Np // tn),
            in_specs=[
                pl.BlockSpec((1, tn, Cxp), lambda b, n: (b, n, 0)),   # x (bf16)
                pl.BlockSpec((1, tn, Cyp), lambda b, n: (b, n, 0)),   # y (bf16)
                pl.BlockSpec((Cxp, midp), lambda b, n: (0, 0)),       # W_self
                pl.BlockSpec((1, midp), lambda b, n: (0, 0)),         # b_self
                pl.BlockSpec((Cyp, midp), lambda b, n: (0, 0)),       # W_y
                pl.BlockSpec((1, midp), lambda b, n: (0, 0)),         # b_y
            ],
            out_specs=pl.BlockSpec((1, tn, 2 * midp), lambda b, n: (b, n, 0)),
        ),
        compiler_params=pltpu.CompilerParams(
            dimension_semantics=("parallel", "parallel"),
            vmem_limit_bytes=vmem),
    )(x_bf, y_bf, wself, bself, wy, by)

    # ---- kernel 2: fx proj + flash attention + f_up + residual ------------
    tq = _pick_tile(Np, cap=512)       # query tile (rows)
    tk = _pick_tile(Np, cap=512)       # kv tile (cols)
    # Keep >= 4 parallel (batch, q-tile) blocks so megacore / v7x dual-TC can
    # split work; only relevant for small workloads where BW doesn't bind.
    while tq > 128 and B * (Np // tq) < 4:
        tq //= 2

    out_pad = pl.pallas_call(
        functools.partial(_attn_kernel, midp=midp, n_valid=N, n_padded=Np),
        out_shape=jax.ShapeDtypeStruct((B, Np, Cxp), jnp.float32),
        grid_spec=pltpu.PrefetchScalarGridSpec(
            num_scalar_prefetch=0,
            grid=(B, Np // tq, Np // tk),
            in_specs=[
                pl.BlockSpec((1, tq, Cxp), lambda b, q, k: (b, q, 0)),        # x (residual + fx)
                pl.BlockSpec((1, tk, 2 * midp), lambda b, q, k: (b, k, 0)),   # [fy | fself]
                pl.BlockSpec((Cxp, midp), lambda b, q, k: (0, 0)),            # W_x
                pl.BlockSpec((1, midp), lambda b, q, k: (0, 0)),              # b_x
                pl.BlockSpec((midp, Cxp), lambda b, q, k: (0, 0)),            # W_up
                pl.BlockSpec((1, Cxp), lambda b, q, k: (0, 0)),               # b_up
            ],
            out_specs=pl.BlockSpec((1, tq, Cxp), lambda b, q, k: (b, q, 0)),
            scratch_shapes=[
                pltpu.VMEM((tq, 1), jnp.float32),        # running max m
                pltpu.VMEM((tq, 1), jnp.float32),        # running sum l
                pltpu.VMEM((tq, midp), jnp.float32),     # f32 accumulator
                pltpu.VMEM((tq, midp), jnp.bfloat16),    # fx tile (bf16)
            ],
        ),
        compiler_params=pltpu.CompilerParams(
            dimension_semantics=("parallel", "parallel", "arbitrary"),
            vmem_limit_bytes=vmem),
    )(xq, kv, wx, bx, wup, bup)

    return out_pad[:, :N, :Cx]


# ---------------------------------------------------------------------------
# Parameter construction (glue): fold eval-mode BN into 1x1 conv weights.
# ---------------------------------------------------------------------------
def _fold_conv_bn(conv_w, gamma, beta, mean, var):
    """conv_w: (Cout, Cin) 1x1 conv (no bias).  BN(conv(x)) == W @ x + b."""
    s = gamma / jnp.sqrt(var + EPS)
    return s[:, None] * conv_w, beta - s * mean


def _fold_double(conv1_w, bn1, conv2_w, bn2):
    W1, b1 = _fold_conv_bn(conv1_w, *bn1)
    W2, b2 = _fold_conv_bn(conv2_w, *bn2)
    return W2 @ W1, W2 @ b1 + b2


def make_bca_params(key, xin_channels, yin_channels, mid_channels):
    """Deterministic conv / (eval-mode) BN parameters, BN folded into affines.

    Note: the PyTorch module zero-inits the f_up BatchNorm weight/bias, which
    makes the whole attention branch vanish at init.  We use non-trivial BN
    stats for f_up so the test exercises the full datapath."""
    ks = jax.random.split(key, 16)
    mid = mid_channels

    def conv(k, cout, cin):
        return jax.random.normal(k, (cout, cin), jnp.float32) * 0.1

    def bn(k, c):
        k1, k2, k3, k4 = jax.random.split(k, 4)
        gamma = 1.0 + 0.1 * jax.random.normal(k1, (c,), jnp.float32)
        beta = 0.1 * jax.random.normal(k2, (c,), jnp.float32)
        mean = 0.1 * jax.random.normal(k3, (c,), jnp.float32)
        var = jnp.abs(jax.random.normal(k4, (c,), jnp.float32)) + 0.5
        return gamma, beta, mean, var

    W_self, b_self = _fold_double(conv(ks[0], mid, xin_channels), bn(ks[1], mid),
                                  conv(ks[2], mid, mid), bn(ks[3], mid))
    W_x, b_x = _fold_double(conv(ks[4], mid, xin_channels), bn(ks[5], mid),
                            conv(ks[6], mid, mid), bn(ks[7], mid))
    W_y, b_y = _fold_double(conv(ks[8], mid, yin_channels), bn(ks[9], mid),
                            conv(ks[10], mid, mid), bn(ks[11], mid))
    W_up, b_up = _fold_conv_bn(conv(ks[12], xin_channels, mid),
                               *bn(ks[13], xin_channels))

    # Kernel layout: rows-of-positions (N, Cin) @ W -> store transposed weights.
    return (W_self.T, b_self[None, :],
            W_x.T, b_x[None, :],
            W_y.T, b_y[None, :],
            W_up.T, b_up[None, :])


# ---------------------------------------------------------------------------
# Full BCA forward on NCHW tensors (glue + kernels).
# ---------------------------------------------------------------------------
def bca_forward(x_nchw, y_nchw, params, *, mid_channels, scale=False):
    B, Cx, H, W = x_nchw.shape
    By, Cy, Hy, Wy = y_nchw.shape
    assert B == By and Hy * Wy == H * W, \
        "BCA requires matching batch and spatial extent"
    N = H * W
    x_flat = jnp.transpose(x_nchw.reshape(B, Cx, N), (0, 2, 1))
    y_flat = jnp.transpose(y_nchw.reshape(B, Cy, N), (0, 2, 1))
    out_flat = bca_pallas(x_flat, y_flat, params,
                          scale=scale, mid_channels=mid_channels)
    return jnp.transpose(out_flat, (0, 2, 1)).reshape(B, Cx, H, W)


# Pure-JAX f32 reference for sanity checking.
def bca_reference(x_nchw, y_nchw, params, *, mid_channels, scale=False):
    B, Cx, H, W = x_nchw.shape
    _, Cy, Hy, Wy = y_nchw.shape
    N = H * W
    W_self, b_self, W_x, b_x, W_y, b_y, W_up, b_up = params
    xf = jnp.transpose(x_nchw.reshape(B, Cx, N), (0, 2, 1))
    yf = jnp.transpose(y_nchw.reshape(B, Cy, Hy * Wy), (0, 2, 1))
    fself = xf @ W_self + b_self
    fx = xf @ W_x + b_x
    fy = yf @ W_y + b_y
    sim = jnp.einsum('bnm,bkm->bnk', fx, fy)
    if scale:
        sim = sim * (mid_channels ** -0.5)
    p = jax.nn.softmax(sim, axis=-1)
    fout = jnp.einsum('bnk,bkm->bnm', p, fself)
    out = fout @ W_up + b_up
    res = xf + out
    return jnp.transpose(res, (0, 2, 1)).reshape(B, Cx, H, W)


if __name__ == "__main__":
    B, Cx, Cy, mid = 2, 4, 6, 8
    key = jax.random.PRNGKey(0)
    kx, ky, kp = jax.random.split(key, 3)
    params = make_bca_params(kp, Cx, Cy, mid)

    fwd = jax.jit(bca_forward, static_argnames=("mid_channels", "scale"))

    # (H, W, scale): 16x16 exercises the exact-tile path; 12x12 (N=144)
    # exercises the padded-N + masked-KV path.
    cases = [(16, 16, False), (16, 16, True), (12, 12, True)]
    for H, W, use_scale in cases:
        x = jax.random.normal(kx, (B, Cx, H, W), jnp.float32)
        y = jax.random.normal(ky, (B, Cy, H, W), jnp.float32)
        out = jax.block_until_ready(
            fwd(x, y, params, mid_channels=mid, scale=use_scale))
        ref = bca_reference(x, y, params, mid_channels=mid, scale=use_scale)
        assert out.shape == (B, Cx, H, W)
        # bf16 MXU inputs + approx reciprocal -> loosened tolerance vs f32 ref.
        max_err = float(jnp.max(jnp.abs(out - ref)))
        assert jnp.allclose(out, ref, atol=3e-2, rtol=3e-2), \
            f"mismatch vs reference (H={H}, scale={use_scale}, max_err={max_err})"

    print("KERNEL_OK")
</pallas_src>

<mosaic_0001>
module attributes {stable_mosaic.version = 11 : i64} {
  func.func @_proj_kernel(%arg0: i32, %arg1: i32, %arg2: memref<1x256x128xbf16, #tpu.memory_space<vmem>>, %arg3: memref<1x256x128xbf16, #tpu.memory_space<vmem>>, %arg4: memref<128x128xbf16, #tpu.memory_space<vmem>>, %arg5: memref<1x128xf32, #tpu.memory_space<vmem>>, %arg6: memref<128x128xbf16, #tpu.memory_space<vmem>>, %arg7: memref<1x128xf32, #tpu.memory_space<vmem>>, %arg8: memref<1x256x256xbf16, #tpu.memory_space<vmem>>) attributes {dimension_semantics = [#tpu.dimension_semantics<parallel>, #tpu.dimension_semantics<parallel>], iteration_bounds = array<i64: 2, 1>, scalar_prefetch = 0 : i64, scratch_operands = 0 : i64, tpu.core_type = #tpu.core_type<tc>, window_params = [{transform_indices = @transform_0, window_bounds = array<i64: 1, 256, 128>}, {transform_indices = @transform_1, window_bounds = array<i64: 1, 256, 128>}, {pipeline_mode = #tpu.pipeline_mode<synchronous>, transform_indices = @transform_2, window_bounds = array<i64: 128, 128>}, {pipeline_mode = #tpu.pipeline_mode<synchronous>, transform_indices = @transform_3, window_bounds = array<i64: 1, 128>}, {pipeline_mode = #tpu.pipeline_mode<synchronous>, transform_indices = @transform_4, window_bounds = array<i64: 128, 128>}, {pipeline_mode = #tpu.pipeline_mode<synchronous>, transform_indices = @transform_5, window_bounds = array<i64: 1, 128>}, {transform_indices = @transform_6, window_bounds = array<i64: 1, 256, 256>}]} {
    %c0 = arith.constant 0 : index
    %c0_0 = arith.constant 0 : index
    %c0_1 = arith.constant 0 : index
    %0 = vector.load %arg2[%c0, %c0_0, %c0_1] : memref<1x256x128xbf16, #tpu.memory_space<vmem>>, vector<1x256x128xbf16>
    %1 = vector.shape_cast %0 : vector<1x256x128xbf16> to vector<256x128xbf16>
    %c0_2 = arith.constant 0 : index
    %c0_3 = arith.constant 0 : index
    %c0_4 = arith.constant 0 : index
    %2 = vector.load %arg3[%c0_2, %c0_3, %c0_4] : memref<1x256x128xbf16, #tpu.memory_space<vmem>>, vector<1x256x128xbf16>
    %3 = vector.shape_cast %2 : vector<1x256x128xbf16> to vector<256x128xbf16>
    %c0_5 = arith.constant 0 : index
    %c0_6 = arith.constant 0 : index
    %4 = vector.load %arg4[%c0_5, %c0_6] : memref<128x128xbf16, #tpu.memory_space<vmem>>, vector<128x128xbf16>
    %cst = arith.constant dense<0.000000e+00> : vector<256x128xf32>
    %5 = tpu.matmul %1, %4, %cst {dimension_numbers = #tpu.dot_dimension_numbers<[1], [0], [0], [1], [0, 0, 1, 1], [], []>} : vector<256x128xbf16>, vector<128x128xbf16>, vector<256x128xf32> -> vector<256x128xf32>
    %c0_7 = arith.constant 0 : index
    %c0_8 = arith.constant 0 : index
    %6 = vector.load %arg5[%c0_7, %c0_8] : memref<1x128xf32, #tpu.memory_space<vmem>>, vector<1x128xf32>
    %7 = vector.broadcast %6 : vector<1x128xf32> to vector<256x128xf32>
    %8 = arith.addf %5, %7 : vector<256x128xf32>
    %c0_9 = arith.constant 0 : index
    %c0_10 = arith.constant 0 : index
    %9 = vector.load %arg6[%c0_9, %c0_10] : memref<128x128xbf16, #tpu.memory_space<vmem>>, vector<128x128xbf16>
    %cst_11 = arith.constant dense<0.000000e+00> : vector<256x128xf32>
    %10 = tpu.matmul %3, %9, %cst_11 {dimension_numbers = #tpu.dot_dimension_numbers<[1], [0], [0], [1], [0, 0, 1, 1], [], []>} : vector<256x128xbf16>, vector<128x128xbf16>, vector<256x128xf32> -> vector<256x128xf32>
    %c0_12 = arith.constant 0 : index
    %c0_13 = arith.constant 0 : index
    %11 = vector.load %arg7[%c0_12, %c0_13] : memref<1x128xf32, #tpu.memory_space<vmem>>, vector<1x128xf32>
    %12 = vector.broadcast %11 : vector<1x128xf32> to vector<256x128xf32>
    %13 = arith.addf %10, %12 : vector<256x128xf32>
    %14 = arith.truncf %13 : vector<256x128xf32> to vector<256x128xbf16>
    %c0_14 = arith.constant 0 : index
    %c0_15 = arith.constant 0 : index
    %c0_16 = arith.constant 0 : index
    %15 = vector.load %arg8[%c0_14, %c0_15, %c0_16] : memref<1x256x256xbf16, #tpu.memory_space<vmem>>, vector<1x256x128xbf16>
    %16 = vector.shape_cast %15 : vector<1x256x128xbf16> to vector<256x128xbf16>
    %17 = vector.shape_cast %14 : vector<256x128xbf16> to vector<1x256x128xbf16>
    tpu.vector_store %arg8[%c0_14, %c0_15, %c0_16], %17 {strides = array<i32>} : memref<1x256x256xbf16, #tpu.memory_space<vmem>>, vector<1x256x128xbf16>,
    %18 = arith.truncf %8 : vector<256x128xf32> to vector<256x128xbf16>
    %c0_17 = arith.constant 0 : index
    %c0_18 = arith.constant 0 : index
    %c128 = arith.constant 128 : index
    %19 = vector.load %arg8[%c0_17, %c0_18, %c128] : memref<1x256x256xbf16, #tpu.memory_space<vmem>>, vector<1x256x128xbf16>
    %20 = vector.shape_cast %19 : vector<1x256x128xbf16> to vector<256x128xbf16>
    %21 = vector.shape_cast %18 : vector<256x128xbf16> to vector<1x256x128xbf16>
    tpu.vector_store %arg8[%c0_17, %c0_18, %c128], %21 {strides = array<i32>} : memref<1x256x256xbf16, #tpu.memory_space<vmem>>, vector<1x256x128xbf16>,
    return
  }
  func.func @transform_0(%arg0: i32, %arg1: i32) -> (i32, i32, i32) {
    %c0_i32 = arith.constant 0 : i32
    %c0_i32_0 = arith.constant 0 : i32
    return %arg0, %arg1, %c0_i32 : i32, i32, i32
  }
  func.func @transform_1(%arg0: i32, %arg1: i32) -> (i32, i32, i32) {
    %c0_i32 = arith.constant 0 : i32
    %c0_i32_0 = arith.constant 0 : i32
    return %arg0, %arg1, %c0_i32 : i32, i32, i32
  }
  func.func @transform_2(%arg0: i32, %arg1: i32) -> (i32, i32) {
    %c0_i32 = arith.constant 0 : i32
    %c0_i32_0 = arith.constant 0 : i32
    %c0_i32_1 = arith.constant 0 : i32
    return %c0_i32, %c0_i32_0 : i32, i32
  }
  func.func @transform_3(%arg0: i32, %arg1: i32) -> (i32, i32) {
    %c0_i32 = arith.constant 0 : i32
    %c0_i32_0 = arith.constant 0 : i32
    %c0_i32_1 = arith.constant 0 : i32
    return %c0_i32, %c0_i32_0 : i32, i32
  }
  func.func @transform_4(%arg0: i32, %arg1: i32) -> (i32, i32) {
    %c0_i32 = arith.constant 0 : i32
    %c0_i32_0 = arith.constant 0 : i32
    %c0_i32_1 = arith.constant 0 : i32
    return %c0_i32, %c0_i32_0 : i32, i32
  }
  func.func @transform_5(%arg0: i32, %arg1: i32) -> (i32, i32) {
    %c0_i32 = arith.constant 0 : i32
    %c0_i32_0 = arith.constant 0 : i32
    %c0_i32_1 = arith.constant 0 : i32
    return %c0_i32, %c0_i32_0 : i32, i32
  }
  func.func @transform_6(%arg0: i32, %arg1: i32) -> (i32, i32, i32) {
    %c0_i32 = arith.constant 0 : i32
    %c0_i32_0 = arith.constant 0 : i32
    return %arg0, %arg1, %c0_i32 : i32, i32, i32
  }
}

module attributes {stable_mosaic.version = 11 : i64} {
  func.func @_attn_kernel(%arg0: i32, %arg1: i32, %arg2: i32, %arg3: memref<1x128x128xf32, #tpu.memory_space<vmem>>, %arg4: memref<1x256x256xbf16, #tpu.memory_space<vmem>>, %arg5: memref<128x128xbf16, #tpu.memory_space<vmem>>, %arg6: memref<1x128xf32, #tpu.memory_space<vmem>>, %arg7: memref<128x128xbf16, #tpu.memory_space<vmem>>, %arg8: memref<1x128xf32, #tpu.memory_space<vmem>>, %arg9: memref<1x128x128xf32, #tpu.memory_space<vmem>>, %arg10: memref<128x1xf32, #tpu.memory_space<vmem>>, %arg11: memref<128x1xf32, #tpu.memory_space<vmem>>, %arg12: memref<128x128xf32, #tpu.memory_space<vmem>>, %arg13: memref<128x128xbf16, #tpu.memory_space<vmem>>) attributes {dimension_semantics = [#tpu.dimension_semantics<parallel>, #tpu.dimension_semantics<parallel>, #tpu.dimension_semantics<arbitrary>], iteration_bounds = array<i64: 2, 2, 1>, scalar_prefetch = 0 : i64, scratch_operands = 4 : i64, tpu.core_type = #tpu.core_type<tc>, window_params = [{transform_indices = @transform_0, window_bounds = array<i64: 1, 128, 128>}, {transform_indices = @transform_1, window_bounds = array<i64: 1, 256, 256>}, {pipeline_mode = #tpu.pipeline_mode<synchronous>, transform_indices = @transform_2, window_bounds = array<i64: 128, 128>}, {pipeline_mode = #tpu.pipeline_mode<synchronous>, transform_indices = @transform_3, window_bounds = array<i64: 1, 128>}, {pipeline_mode = #tpu.pipeline_mode<synchronous>, transform_indices = @transform_4, window_bounds = array<i64: 128, 128>}, {pipeline_mode = #tpu.pipeline_mode<synchronous>, transform_indices = @transform_5, window_bounds = array<i64: 1, 128>}, {transform_indices = @transform_6, window_bounds = array<i64: 1, 128, 128>}]} {
    %c0_i32 = arith.constant 0 : i32
    %0 = arith.cmpi eq, %arg2, %c0_i32 : i32
    %1 = arith.extui %0 : i1 to i32
    %c0_i32_0 = arith.constant 0 : i32
    %2 = arith.cmpi ne, %1, %c0_i32_0 : i32
    scf.if %2 {
      %cst_24 = arith.constant 0xFF800000 : f32
      %35 = vector.broadcast %cst_24 : f32 to vector<128x1xf32>
      %c0_25 = arith.constant 0 : index
      %c0_26 = arith.constant 0 : index
      %36 = vector.load %arg10[%c0_25, %c0_26] : memref<128x1xf32, #tpu.memory_space<vmem>>, vector<128x1xf32>
      tpu.vector_store %arg10[%c0_25, %c0_26], %35 {strides = array<i32>} : memref<128x1xf32, #tpu.memory_space<vmem>>, vector<128x1xf32>,
      %cst_27 = arith.constant 0.000000e+00 : f32
      %37 = vector.broadcast %cst_27 : f32 to vector<128x1xf32>
      %c0_28 = arith.constant 0 : index
      %c0_29 = arith.constant 0 : index
      %38 = vector.load %arg11[%c0_28, %c0_29] : memref<128x1xf32, #tpu.memory_space<vmem>>, vector<128x1xf32>
      tpu.vector_store %arg11[%c0_28, %c0_29], %37 {strides = array<i32>} : memref<128x1xf32, #tpu.memory_space<vmem>>, vector<128x1xf32>,
      %cst_30 = arith.constant 0.000000e+00 : f32
      %39 = vector.broadcast %cst_30 : f32 to vector<128x128xf32>
      %c0_31 = arith.constant 0 : index
      %c0_32 = arith.constant 0 : index
      %40 = vector.load %arg12[%c0_31, %c0_32] : memref<128x128xf32, #tpu.memory_space<vmem>>, vector<128x128xf32>
      tpu.vector_store %arg12[%c0_31, %c0_32], %39 {strides = array<i32>} : memref<128x128xf32, #tpu.memory_space<vmem>>, vector<128x128xf32>,
      %c0_33 = arith.constant 0 : index
      %c0_34 = arith.constant 0 : index
      %c0_35 = arith.constant 0 : index
      %41 = vector.load %arg3[%c0_33, %c0_34, %c0_35] : memref<1x128x128xf32, #tpu.memory_space<vmem>>, vector<1x128x128xf32>
      %42 = vector.shape_cast %41 : vector<1x128x128xf32> to vector<128x128xf32>
      %43 = arith.truncf %42 : vector<128x128xf32> to vector<128x128xbf16>
      %c0_36 = arith.constant 0 : index
      %c0_37 = arith.constant 0 : index
      %44 = vector.load %arg5[%c0_36, %c0_37] : memref<128x128xbf16, #tpu.memory_space<vmem>>, vector<128x128xbf16>
      %cst_38 = arith.constant dense<0.000000e+00> : vector<128x128xf32>
      %45 = tpu.matmul %43, %44, %cst_38 {dimension_numbers = #tpu.dot_dimension_numbers<[1], [0], [0], [1], [0, 0, 1, 1], [], []>} : vector<128x128xbf16>, vector<128x128xbf16>, vector<128x128xf32> -> vector<128x128xf32>
      %c0_39 = arith.constant 0 : index
      %c0_40 = arith.constant 0 : index
      %46 = vector.load %arg6[%c0_39, %c0_40] : memref<1x128xf32, #tpu.memory_space<vmem>>, vector<1x128xf32>
      %47 = vector.broadcast %46 : vector<1x128xf32> to vector<128x128xf32>
      %48 = arith.addf %45, %47 : vector<128x128xf32>
      %49 = arith.truncf %48 : vector<128x128xf32> to vector<128x128xbf16>
      %c0_41 = arith.constant 0 : index
      %c0_42 = arith.constant 0 : index
      %50 = vector.load %arg13[%c0_41, %c0_42] : memref<128x128xbf16, #tpu.memory_space<vmem>>, vector<128x128xbf16>
      tpu.vector_store %arg13[%c0_41, %c0_42], %49 {strides = array<i32>} : memref<128x128xbf16, #tpu.memory_space<vmem>>, vector<128x128xbf16>,
    } else {
    }
    %c0 = arith.constant 0 : index
    %c0_1 = arith.constant 0 : index
    %c0_2 = arith.constant 0 : index
    %3 = vector.load %arg4[%c0, %c0_1, %c0_2] : memref<1x256x256xbf16, #tpu.memory_space<vmem>>, vector<1x256x128xbf16>
    %4 = vector.shape_cast %3 : vector<1x256x128xbf16> to vector<256x128xbf16>
    %c0_3 = arith.constant 0 : index
    %c0_4 = arith.constant 0 : index
    %c128 = arith.constant 128 : index
    %5 = vector.load %arg4[%c0_3, %c0_4, %c128] : memref<1x256x256xbf16, #tpu.memory_space<vmem>>, vector<1x256x128xbf16>
    %6 = vector.shape_cast %5 : vector<1x256x128xbf16> to vector<256x128xbf16>
    %c0_5 = arith.constant 0 : index
    %c0_6 = arith.constant 0 : index
    %7 = vector.load %arg13[%c0_5, %c0_6] : memref<128x128xbf16, #tpu.memory_space<vmem>>, vector<128x128xbf16>
    %cst = arith.constant dense<0.000000e+00> : vector<128x256xf32>
    %8 = tpu.matmul %7, %4, %cst {dimension_numbers = #tpu.dot_dimension_numbers<[1], [1], [0], [0], [0, 0, 1, 0], [], []>} : vector<128x128xbf16>, vector<256x128xbf16>, vector<128x256xf32> -> vector<128x256xf32>
    %c0_7 = arith.constant 0 : index
    %c0_8 = arith.constant 0 : index
    %9 = vector.load %arg10[%c0_7, %c0_8] : memref<128x1xf32, #tpu.memory_space<vmem>>, vector<128x1xf32>
    %cst_9 = arith.constant dense<0xFF800000> : vector<128xf32>
    %10 = vector.multi_reduction <maximumf>, %8, %cst_9 [1] : vector<128x256xf32> to vector<128xf32>
    %11 = vector.shape_cast %10 : vector<128xf32> to vector<128x1xf32>
    %12 = arith.maximumf %9, %11 : vector<128x1xf32>
    %13 = arith.subf %9, %12 : vector<128x1xf32>
    %14 = math.exp %13 : vector<128x1xf32>
    %15 = vector.broadcast %12 : vector<128x1xf32> to vector<128x256xf32>
    %16 = arith.subf %8, %15 : vector<128x256xf32>
    %17 = math.exp %16 : vector<128x256xf32>
    %c0_10 = arith.constant 0 : index
    %c0_11 = arith.constant 0 : index
    %18 = vector.load %arg11[%c0_10, %c0_11] : memref<128x1xf32, #tpu.memory_space<vmem>>, vector<128x1xf32>
    %19 = arith.mulf %14, %18 : vector<128x1xf32>
    %cst_12 = arith.constant dense<0.000000e+00> : vector<128xf32>
    %20 = vector.multi_reduction <add>, %17, %cst_12 [1] : vector<128x256xf32> to vector<128xf32>
    %21 = vector.shape_cast %20 : vector<128xf32> to vector<128x1xf32>
    %22 = arith.addf %19, %21 : vector<128x1xf32>
    %c0_13 = arith.constant 0 : index
    %c0_14 = arith.constant 0 : index
    %23 = vector.load %arg11[%c0_13, %c0_14] : memref<128x1xf32, #tpu.memory_space<vmem>>, vector<128x1xf32>
    tpu.vector_store %arg11[%c0_13, %c0_14], %22 {strides = array<i32>} : memref<128x1xf32, #tpu.memory_space<vmem>>, vector<128x1xf32>,
    %c0_15 = arith.constant 0 : index
    %c0_16 = arith.constant 0 : index
    %24 = vector.load %arg12[%c0_15, %c0_16] : memref<128x128xf32, #tpu.memory_space<vmem>>, vector<128x128xf32>
    %25 = vector.broadcast %14 : vector<128x1xf32> to vector<128x128xf32>
    %26 = arith.mulf %25, %24 : vector<128x128xf32>
    %27 = arith.truncf %17 : vector<128x256xf32> to vector<128x256xbf16>
    %cst_17 = arith.constant dense<0.000000e+00> : vector<128x128xf32>
    %28 = tpu.matmul %27, %6, %cst_17 {dimension_numbers = #tpu.dot_dimension_numbers<[1], [0], [0], [1], [0, 0, 1, 1], [], []>} : vector<128x256xbf16>, vector<256x128xbf16>, vector<128x128xf32> -> vector<128x128xf32>
    %29 = arith.addf %26, %28 : vector<128x128xf32>
    %c0_18 = arith.constant 0 : index
    %c0_19 = arith.constant 0 : index
    %30 = vector.load %arg12[%c0_18, %c0_19] : memref<128x128xf32, #tpu.memory_space<vmem>>, vector<128x128xf32>
    tpu.vector_store %arg12[%c0_18, %c0_19], %29 {strides = array<i32>} : memref<128x128xf32, #tpu.memory_space<vmem>>, vector<128x128xf32>,
    %c0_20 = arith.constant 0 : index
    %c0_21 = arith.constant 0 : index
    %31 = vector.load %arg10[%c0_20, %c0_21] : memref<128x1xf32, #tpu.memory_space<vmem>>, vector<128x1xf32>
    tpu.vector_store %arg10[%c0_20, %c0_21], %12 {strides = array<i32>} : memref<128x1xf32, #tpu.memory_space<vmem>>, vector<128x1xf32>,
    %c0_i32_22 = arith.constant 0 : i32
    %32 = arith.cmpi eq, %arg2, %c0_i32_22 : i32
    %33 = arith.extui %32 : i1 to i32
    %c0_i32_23 = arith.constant 0 : i32
    %34 = arith.cmpi ne, %33, %c0_i32_23 : i32
    scf.if %34 {
      %c0_24 = arith.constant 0 : index
      %c0_25 = arith.constant 0 : index
      %35 = vector.load %arg12[%c0_24, %c0_25] : memref<128x128xf32, #tpu.memory_space<vmem>>, vector<128x128xf32>
      %c0_26 = arith.constant 0 : index
      %c0_27 = arith.constant 0 : index
      %36 = vector.load %arg11[%c0_26, %c0_27] : memref<128x1xf32, #tpu.memory_space<vmem>>, vector<128x1xf32>
      %37 = tpu.reciprocal %36 {approx = true} : vector<128x1xf32> -> vector<128x1xf32>
      %38 = vector.broadcast %37 : vector<128x1xf32> to vector<128x128xf32>
      %39 = arith.mulf %35, %38 : vector<128x128xf32>
      %40 = arith.truncf %39 : vector<128x128xf32> to vector<128x128xbf16>
      %c0_28 = arith.constant 0 : index
      %c0_29 = arith.constant 0 : index
      %41 = vector.load %arg7[%c0_28, %c0_29] : memref<128x128xbf16, #tpu.memory_space<vmem>>, vector<128x128xbf16>
      %cst_30 = arith.constant dense<0.000000e+00> : vector<128x128xf32>
      %42 = tpu.matmul %40, %41, %cst_30 {dimension_numbers = #tpu.dot_dimension_numbers<[1], [0], [0], [1], [0, 0, 1, 1], [], []>} : vector<128x128xbf16>, vector<128x128xbf16>, vector<128x128xf32> -> vector<128x128xf32>
      %c0_31 = arith.constant 0 : index
      %c0_32 = arith.constant 0 : index
      %43 = vector.load %arg8[%c0_31, %c0_32] : memref<1x128xf32, #tpu.memory_space<vmem>>, vector<1x128xf32>
      %44 = vector.broadcast %43 : vector<1x128xf32> to vector<128x128xf32>
      %45 = arith.addf %42, %44 : vector<128x128xf32>
      %c0_33 = arith.constant 0 : index
      %c0_34 = arith.constant 0 : index
      %c0_35 = arith.constant 0 : index
      %46 = vector.load %arg3[%c0_33, %c0_34, %c0_35] : memref<1x128x128xf32, #tpu.memory_space<vmem>>, vector<1x128x128xf32>
      %47 = vector.shape_cast %46 : vector<1x128x128xf32> to vector<128x128xf32>
      %48 = arith.addf %47, %45 : vector<128x128xf32>
      %c0_36 = arith.constant 0 : index
      %c0_37 = arith.constant 0 : index
      %c0_38 = arith.constant 0 : index
      %49 = vector.load %arg9[%c0_36, %c0_37, %c0_38] : memref<1x128x128xf32, #tpu.memory_space<vmem>>, vector<1x128x128xf32>
      %50 = vector.shape_cast %49 : vector<1x128x128xf32> to vector<128x128xf32>
      %51 = vector.shape_cast %48 : vector<128x128xf32> to vector<1x128x128xf32>
      tpu.vector_store %arg9[%c0_36, %c0_37, %c0_38], %51 {strides = array<i32>} : memref<1x128x128xf32, #tpu.memory_space<vmem>>, vector<1x128x128xf32>,
    } else {
    }
    return
  }
  func.func @transform_0(%arg0: i32, %arg1: i32, %arg2: i32) -> (i32, i32, i32) {
    %c0_i32 = arith.constant 0 : i32
    %c0_i32_0 = arith.constant 0 : i32
    return %arg0, %arg1, %c0_i32 : i32, i32, i32
  }
  func.func @transform_1(%arg0: i32, %arg1: i32, %arg2: i32) -> (i32, i32, i32) {
    %c0_i32 = arith.constant 0 : i32
    %c0_i32_0 = arith.constant 0 : i32
    return %arg0, %arg2, %c0_i32 : i32, i32, i32
  }
  func.func @transform_2(%arg0: i32, %arg1: i32, %arg2: i32) -> (i32, i32) {
    %c0_i32 = arith.constant 0 : i32
    %c0_i32_0 = arith.constant 0 : i32
    %c0_i32_1 = arith.constant 0 : i32
    return %c0_i32, %c0_i32_0 : i32, i32
  }
  func.func @transform_3(%arg0: i32, %arg1: i32, %arg2: i32) -> (i32, i32) {
    %c0_i32 = arith.constant 0 : i32
    %c0_i32_0 = arith.constant 0 : i32
    %c0_i32_1 = arith.constant 0 : i32
    return %c0_i32, %c0_i32_0 : i32, i32
  }
  func.func @transform_4(%arg0: i32, %arg1: i32, %arg2: i32) -> (i32, i32) {
    %c0_i32 = arith.constant 0 : i32
    %c0_i32_0 = arith.constant 0 : i32
    %c0_i32_1 = arith.constant 0 : i32
    return %c0_i32, %c0_i32_0 : i32, i32
  }
  func.func @transform_5(%arg0: i32, %arg1: i32, %arg2: i32) -> (i32, i32) {
    %c0_i32 = arith.constant 0 : i32
    %c0_i32_0 = arith.constant 0 : i32
    %c0_i32_1 = arith.constant 0 : i32
    return %c0_i32, %c0_i32_0 : i32, i32
  }
  func.func @transform_6(%arg0: i32, %arg1: i32, %arg2: i32) -> (i32, i32, i32) {
    %c0_i32 = arith.constant 0 : i32
    %c0_i32_0 = arith.constant 0 : i32
    return %arg0, %arg1, %c0_i32 : i32, i32, i32
  }
}

</mosaic_0001>

<bundles_post_ra>
// kernel: bca_forward.2
= control target key start
LH: loop header
LB: loop body
LE: loop exit
PB: predicated region body
PF: predicated region fallthrough
CT: control target
= control target key end

     0   :  { %s1950_s21 = smov 0   ;;  %s1952_s22 = smov 0   ;;  %s2214_s0 = inlined_call_operand.vmem [shape: bf16[2,256,128], index: 0, kind: input, shape index: {}]   ;;  %s2215_s1 = inlined_call_operand.vmem [shape: bf16[2,256,128], index: 1, kind: input, shape index: {}]   ;;  %s2216_s2 = inlined_call_operand.vmem [shape: bf16[128,128], index: 2, kind: input, shape index: {}]   ;;  %s2217_s3 = inlined_call_operand.vmem [shape: f32[1,128], index: 3, kind: input, shape index: {}]   ;;  %s2218_s4 = inlined_call_operand.vmem [shape: bf16[128,128], index: 4, kind: input, shape index: {}]   ;;  %s2219_s5 = inlined_call_operand.vmem [shape: f32[1,128], index: 5, kind: input, shape index: {}]   ;;  %s2220_s6 = inlined_call_operand.vmem [shape: bf16[2,256,256], index: 6, kind: output, shape index: {}]  }
   0x1   :  { %s1954_s23 = smov 0  }
   0x2 LB: > { %s28_s24 = sadd.s32 1, %s1909_s22  ;;  %p1485_p0 = scmp.ge.s32.totalorder %s1913_s23, 1  ;;  %s1913_s23 = sphi %s1954_s23, %s16_s23   ;;  %s1909_s22 = sphi %s1952_s22, %s2222_s22   ;;  %s1905_s21 = sphi %s1950_s21, %s2221_s21  }
   0x3   : > { %p30_p1 = scmp.ge.s32.totalorder %s28_s24, 2  ;;  %p250_p2 = scmp.lt.s32.totalorder %s1913_s23, 3 }
   0x5   : > { %s2224_s24 = smov (%p30_p1, %s28_s24), 0  ;;  %p251_p3 = pnand %p1485_p0, %p250_p2 }
   0x6   : > { %p299_p4 = scmp.lt.s32.totalorder (!%p251_p3), %s1905_s21, 1 }
   0x7   : > { %254 = sbr.rel (%p251_p3) target bundleno = 306 (0x132), region = 44 }
   0xc   : > { %v1843_v0 = vld [vmem:[%s2216_s2 + $0x38] sm:$0xff]   ;;  %v1845_v2 = vld [vmem:[%s2216_s2 + $0x30] sm:$0xff]   ;;  %v1847_v4 = vld [vmem:[%s2216_s2 + $0x28] sm:$0xff]   ;;  %s2226_s21 = smov (!%p299_p4, %s1905_s21), 1 }
   0xd   : > { %v1844_v1 = vld [vmem:[%s2218_s4 + $0x38] sm:$0xff]   ;;  %1723 = vmatprep.subr.bf16.mxu0 %v1843_v0  ;;  %v1846_v3 = vld [vmem:[%s2218_s4 + $0x30] sm:$0xff]   ;;  %v1848_v5 = vld [vmem:[%s2218_s4 + $0x28] sm:$0xff]   ;;  %s1608_s17 = sshll.u32 %s2226_s21, 7  ;;  %s1610_s26 = sshll.u32 %s2226_s21, 8 }
   0xe   : > { %1771 = vmatprep.subr.bf16.mxu1 %v1844_v1  ;;  %1724 = vmatpush3.bf16.msra.mxu0 %v1843_v0  ;;  %v1849_v6 = vld [vmem:[%s2216_s2 + $0x20] sm:$0xff]   ;;  %v1851_v8 = vld [vmem:[%s2216_s2 + $0x18] sm:$0xff]   ;;  %s2004_s28 = scalar_lea.vmem %s2214_s0, %s1608_s17  ;;  %v1853_v10 = vld [vmem:[%s2216_s2 + $0x10] sm:$0xff]   ;;  %s2012_s9 = scalar_lea.vmem %s2215_s1, %s1608_s17 }
   0xf   : > { %1772 = vmatpush3.bf16.msra.mxu1 %v1844_v1  ;;  %1725 = vmatprep.subr.bf16.mxu0 %v1845_v2  ;;  %v1850_v7 = vld [vmem:[%s2218_s4 + $0x20] sm:$0xff]   ;;  %v1852_v9 = vld [vmem:[%s2218_s4 + $0x18] sm:$0xff]   ;;  %v1854_v11 = vld [vmem:[%s2218_s4 + $0x10] sm:$0xff]   ;;  %s2076_s7 = scalar_lea.vmem %s2220_s6, %s1610_s26 }
  0x10   : > { %1773 = vmatprep.subr.bf16.mxu1 %v1846_v3  ;;  %v1859_v12 = vld [vmem:[%s2004_s28] sm:$0xff]   ;;  %v1855_v14 = vld [vmem:[%s2216_s2 + $0x8] sm:$0xff]   ;;  %v1863_v20 = vld [vmem:[%s2004_s28 + $0x10] sm:$0xff]  }
  0x11   : > { %v1860_v13 = vld [vmem:[%s2012_s9] sm:$0xff]   ;;  %1739 = vmatprep.mubr.bf16.mxu0 %v1859_v12  ;;  %v1856_v15 = vld [vmem:[%s2218_s4 + $0x8] sm:$0xff]   ;;  %v1864_v21 = vld [vmem:[%s2012_s9 + $0x10] sm:$0xff]  }
  0x12   : > { %1726 = vmatpush3.bf16.msra.mxu0 %v1845_v2  ;;  %1787 = vmatprep.mubr.bf16.mxu1 %v1860_v13  ;;  %v1857_v16 = vld [vmem:[%s2216_s2] sm:$0xff]   ;;  %v1861_v18 = vld [vmem:[%s2004_s28 + $0x8] sm:$0xff]   ;;  %v1865_v22 = vld [vmem:[%s2004_s28 + $0x18] sm:$0xff]  }
  0x13   : > { %1774 = vmatpush3.bf16.msra.mxu1 %v1846_v3  ;;  %1727 = vmatprep.subr.bf16.mxu0 %v1847_v4  ;;  %v1858_v17 = vld [vmem:[%s2218_s4] sm:$0xff]   ;;  %v1862_v19 = vld [vmem:[%s2012_s9 + $0x8] sm:$0xff]   ;;  %v1866_v23 = vld [vmem:[%s2012_s9 + $0x18] sm:$0xff]  }
  0x14   : > { %1775 = vmatprep.subr.bf16.mxu1 %v1848_v5  ;;  %v1867_v24 = vld [vmem:[%s2004_s28 + $0x20] sm:$0xff]   ;;  %v1869_v26 = vld [vmem:[%s2004_s28 + $0x28] sm:$0xff]   ;;  %v1871_v28 = vld [vmem:[%s2004_s28 + $0x30] sm:$0xff]  }
  0x15   : > { %v1868_v25 = vld [vmem:[%s2012_s9 + $0x20] sm:$0xff]   ;;  %v1870_v27 = vld [vmem:[%s2012_s9 + $0x28] sm:$0xff]   ;;  %v1872_v29 = vld [vmem:[%s2012_s9 + $0x30] sm:$0xff]  }
  0x16   : > { %1728 = vmatpush3.bf16.msra.mxu0 %v1847_v4  ;;  %v1873_v30 = vld [vmem:[%s2004_s28 + $0x38] sm:$0xff]   ;;  %v1875_v32 = vld [vmem:[%s2004_s28 + $0x40] sm:$0xff]   ;;  %v1877_v34 = vld [vmem:[%s2004_s28 + $0x48] sm:$0xff]  }
  0x17   : > { %1776 = vmatpush3.bf16.msra.mxu1 %v1848_v5  ;;  %1729 = vmatprep.subr.bf16.mxu0 %v1849_v6  ;;  %v1874_v31 = vld [vmem:[%s2012_s9 + $0x38] sm:$0xff]   ;;  %v1876_v33 = vld [vmem:[%s2012_s9 + $0x40] sm:$0xff]   ;;  %v1878_v35 = vld [vmem:[%s2012_s9 + $0x48] sm:$0xff]  }
  0x18   : > { %1777 = vmatprep.subr.bf16.mxu1 %v1850_v7  ;;  %v1879_v36 = vld [vmem:[%s2004_s28 + $0x50] sm:$0xff]   ;;  %v1881_v38 = vld [vmem:[%s2004_s28 + $0x58] sm:$0xff]   ;;  %v1883_v40 = vld [vmem:[%s2004_s28 + $0x60] sm:$0xff]  }
  0x19   : > { %v1880_v37 = vld [vmem:[%s2012_s9 + $0x50] sm:$0xff]   ;;  %v1882_v39 = vld [vmem:[%s2012_s9 + $0x58] sm:$0xff]   ;;  %v1884_v41 = vld [vmem:[%s2012_s9 + $0x60] sm:$0xff]  }
  0x1a   : > { %1730 = vmatpush3.bf16.msra.mxu0 %v1849_v6  ;;  %v1885_v42 = vld [vmem:[%s2004_s28 + $0x68] sm:$0xff]   ;;  %v1887_v44 = vld [vmem:[%s2004_s28 + $0x70] sm:$0xff]   ;;  %v1889_v46 = vld [vmem:[%s2004_s28 + $0x78] sm:$0xff]  }
  0x1b   : > { %1778 = vmatpush3.bf16.msra.mxu1 %v1850_v7  ;;  %1731 = vmatprep.subr.bf16.mxu0 %v1851_v8  ;;  %v1886_v43 = vld [vmem:[%s2012_s9 + $0x68] sm:$0xff]   ;;  %v1888_v45 = vld [vmem:[%s2012_s9 + $0x70] sm:$0xff]   ;;  %v1890_v47 = vld [vmem:[%s2012_s9 + $0x78] sm:$0xff]  }
  0x1c   : > { %1779 = vmatprep.subr.bf16.mxu1 %v1852_v9  ;;  %v2064_v48 = vld [vmem:[%s2217_s3] ss:$0 sm:$0xff] }
  0x1d   : > { %v2070_v49 = vld [vmem:[%s2219_s5] ss:$0 sm:$0xff] }
  0x1e   : > { %1732 = vmatpush3.bf16.msra.mxu0 %v1851_v8 }
  0x1f   : > { %1780 = vmatpush3.bf16.msra.mxu1 %v1852_v9  ;;  %1733 = vmatprep.subr.bf16.mxu0 %v1853_v10 }
  0x20   : > { %1781 = vmatprep.subr.bf16.mxu1 %v1854_v11 }
  0x22   : > { %1734 = vmatpush3.bf16.msra.mxu0 %v1853_v10 }
  0x23   : > { %1782 = vmatpush3.bf16.msra.mxu1 %v1854_v11  ;;  %1735 = vmatprep.subr.bf16.mxu0 %v1855_v14 }
  0x24   : > { %1783 = vmatprep.subr.bf16.mxu1 %v1856_v15 }
  0x26   : > { %1736 = vmatpush3.bf16.msra.mxu0 %v1855_v14 }
  0x27   : > { %1784 = vmatpush3.bf16.msra.mxu1 %v1856_v15  ;;  %1737 = vmatprep.subr.bf16.mxu0 %v1857_v16 }
  0x28   : > { %1785 = vmatprep.subr.bf16.mxu1 %v1858_v17 }
  0x2a   : > { %1738 = vmatpush3.bf16.msra.mxu0 %v1857_v16 }
  0x2b   : > { %1786 = vmatpush3.bf16.msra.mxu1 %v1858_v17 }
  0x2d   : > { %1740 = vmatmul.mubr.bf16.vlgmr.msra.gmra.mxu0 %v1861_v18 }
  0x2e   : > { %1788 = vmatmul.mubr.bf16.vlgmr.msra.gmra.mxu1 %v1862_v19  ;;  %1743 = vmatprep.mubr.bf16.mxu0 %v1863_v20 }
  0x2f   : > { %1791 = vmatprep.mubr.bf16.mxu1 %v1864_v21 }
  0x35   : > { %1744 = vmatmul.mubr.bf16.gmra.mxu0 %v1865_v22 }
  0x36   : > { %1792 = vmatmul.mubr.bf16.gmra.mxu1 %v1866_v23  ;;  %1747 = vmatprep.mubr.bf16.mxu0 %v1867_v24 }
  0x37   : > { %1795 = vmatprep.mubr.bf16.mxu1 %v1868_v25 }
  0x3d   : > { %1748 = vmatmul.mubr.bf16.gmra.mxu0 %v1869_v26 }
  0x3e   : > { %1796 = vmatmul.mubr.bf16.gmra.mxu1 %v1870_v27  ;;  %1751 = vmatprep.mubr.bf16.mxu0 %v1871_v28 }
  0x3f   : > { %1799 = vmatprep.mubr.bf16.mxu1 %v1872_v29 }
  0x45   : > { %1752 = vmatmul.mubr.bf16.gmra.mxu0 %v1873_v30 }
  0x46   : > { %1800 = vmatmul.mubr.bf16.gmra.mxu1 %v1874_v31  ;;  %1755 = vmatprep.mubr.bf16.mxu0 %v1875_v32 }
  0x47   : > { %1803 = vmatprep.mubr.bf16.mxu1 %v1876_v33 }
  0x4d   : > { %1756 = vmatmul.mubr.bf16.gmra.mxu0 %v1877_v34 }
  0x4e   : > { %1804 = vmatmul.mubr.bf16.gmra.mxu1 %v1878_v35  ;;  %1759 = vmatprep.mubr.bf16.mxu0 %v1879_v36 }
  0x4f   : > { %1807 = vmatprep.mubr.bf16.mxu1 %v1880_v37 }
  0x55   : > { %1760 = vmatmul.mubr.bf16.gmra.mxu0 %v1881_v38 }
  0x56   : > { %1808 = vmatmul.mubr.bf16.gmra.mxu1 %v1882_v39  ;;  %1763 = vmatprep.mubr.bf16.mxu0 %v1883_v40 }
  0x57   : > { %1811 = vmatprep.mubr.bf16.mxu1 %v1884_v41 }
  0x5d   : > { %1764 = vmatmul.mubr.bf16.gmra.mxu0 %v1885_v42 }
  0x5e   : > { %1812 = vmatmul.mubr.bf16.gmra.mxu1 %v1886_v43  ;;  %1767 = vmatprep.mubr.bf16.mxu0 %v1887_v44 }
  0x5f   : > { %1815 = vmatprep.mubr.bf16.mxu1 %v1888_v45 }
  0x65   : > { %1768 = vmatmul.mubr.bf16.gmra.mxu0 %v1889_v46 }
  0x66   : > { %1816 = vmatmul.mubr.bf16.gmra.mxu1 %v1890_v47 }
  0xed   : > { %v1741_v50 = vpop.f32.mrf.mxu0 }
  0xee   : > { %v604_v51 = vadd.f32 %v1741_v50, %v2064_v48  ;;  %v1789_v52 = vpop.f32.mrf.mxu1 }
  0xef   : > { %v932_v53 = vadd.f32 %v1789_v52, %v2070_v49  ;;  %v595_v54 = vpop.f32.mrf.mxu0 }
  0xf0   : > { %v1645_v55 = vpack.c.bf16 %v604_v51, %v604_v51  ;;  %v596_v56 = vadd.f32 %v2064_v48, %v595_v54  ;;  %v923_v57 = vpop.f32.mrf.mxu1 }
  0xf1   : > { %v1613_v58 = vpack.c.bf16 %v932_v53, %v932_v53  ;;  %v924_v59 = vadd.f32 %v2070_v49, %v923_v57  ;;  %v1742_v60 = vpop.f32.mrf.mxu0 }
  0xf2   : > { %1340 = vst [vmem:[%s2076_s7 + $0x14] sm:$0xf] %v1645_v55  ;;  %v1643_v61 = vpack.c.bf16 %v596_v56, %v596_v56  ;;  %v607_v62 = vadd.f32 %v1742_v60, %v2064_v48  ;;  %v1790_v63 = vpop.f32.mrf.mxu1 }
  0xf3   : > { %1180 = vst [vmem:[%s2076_s7 + $0x10] sm:$0xf] %v1613_v58  ;;  %v1611_v0 = vpack.c.bf16 %v924_v59, %v924_v59  ;;  %v935_v1 = vadd.f32 %v1790_v63, %v2070_v49  ;;  %v598_v2 = vpop.f32.mrf.mxu0 }
  0xf4   : > { %1338 = vst [vmem:[%s2076_s7 + $0x4] sm:$0xf] %v1643_v61  ;;  %v1646_v3 = vpack.c.bf16 %v607_v62, %v607_v62  ;;  %v599_v4 = vadd.f32 %v2064_v48, %v598_v2  ;;  %v926_v5 = vpop.f32.mrf.mxu1 }
  0xf5   : > { %1178 = vst [vmem:[%s2076_s7] sm:$0xf] %v1611_v0  ;;  %v1614_v6 = vpack.c.bf16 %v935_v1, %v935_v1  ;;  %v927_v7 = vadd.f32 %v2070_v49, %v926_v5  ;;  %v1745_v8 = vpop.f32.mrf.mxu0 }
  0xf6   : > { %1341 = vst [vmem:[%s2076_s7 + $0x1c] sm:$0xf] %v1646_v3  ;;  %v1644_v9 = vpack.c.bf16 %v599_v4, %v599_v4  ;;  %v620_v10 = vadd.f32 %v1745_v8, %v2064_v48  ;;  %v1793_v11 = vpop.f32.mrf.mxu1 }
  0xf7   : > { %1181 = vst [vmem:[%s2076_s7 + $0x18] sm:$0xf] %v1614_v6  ;;  %v1612_v12 = vpack.c.bf16 %v927_v7, %v927_v7  ;;  %v948_v13 = vadd.f32 %v1793_v11, %v2070_v49  ;;  %v611_v14 = vpop.f32.mrf.mxu0 }
  0xf8   : > { %1339 = vst [vmem:[%s2076_s7 + $0xc] sm:$0xf] %v1644_v9  ;;  %v1649_v15 = vpack.c.bf16 %v620_v10, %v620_v10  ;;  %v612_v16 = vadd.f32 %v2064_v48, %v611_v14  ;;  %v939_v17 = vpop.f32.mrf.mxu1 }
  0xf9   : > { %1179 = vst [vmem:[%s2076_s7 + $0x8] sm:$0xf] %v1612_v12  ;;  %v1617_v18 = vpack.c.bf16 %v948_v13, %v948_v13  ;;  %v940_v19 = vadd.f32 %v2070_v49, %v939_v17  ;;  %v1746_v20 = vpop.f32.mrf.mxu0 }
  0xfa   : > { %1344 = vst [vmem:[%s2076_s7 + $0x34] sm:$0xf] %v1649_v15  ;;  %v1647_v21 = vpack.c.bf16 %v612_v16, %v612_v16  ;;  %v623_v22 = vadd.f32 %v1746_v20, %v2064_v48  ;;  %v1794_v23 = vpop.f32.mrf.mxu1 }
  0xfb   : > { %1184 = vst [vmem:[%s2076_s7 + $0x30] sm:$0xf] %v1617_v18  ;;  %v1615_v24 = vpack.c.bf16 %v940_v19, %v940_v19  ;;  %v951_v25 = vadd.f32 %v1794_v23, %v2070_v49  ;;  %v614_v26 = vpop.f32.mrf.mxu0 }
  0xfc   : > { %1342 = vst [vmem:[%s2076_s7 + $0x24] sm:$0xf] %v1647_v21  ;;  %v1650_v27 = vpack.c.bf16 %v623_v22, %v623_v22  ;;  %v615_v28 = vadd.f32 %v2064_v48, %v614_v26  ;;  %v942_v29 = vpop.f32.mrf.mxu1 }
  0xfd   : > { %1182 = vst [vmem:[%s2076_s7 + $0x20] sm:$0xf] %v1615_v24  ;;  %v1618_v30 = vpack.c.bf16 %v951_v25, %v951_v25  ;;  %v943_v31 = vadd.f32 %v2070_v49, %v942_v29  ;;  %v1749_v32 = vpop.f32.mrf.mxu0 }
  0xfe   : > { %1345 = vst [vmem:[%s2076_s7 + $0x3c] sm:$0xf] %v1650_v27  ;;  %v1648_v33 = vpack.c.bf16 %v615_v28, %v615_v28  ;;  %v636_v34 = vadd.f32 %v1749_v32, %v2064_v48  ;;  %v1797_v35 = vpop.f32.mrf.mxu1 }
  0xff   : > { %1185 = vst [vmem:[%s2076_s7 + $0x38] sm:$0xf] %v1618_v30  ;;  %v1616_v36 = vpack.c.bf16 %v943_v31, %v943_v31  ;;  %v964_v37 = vadd.f32 %v1797_v35, %v2070_v49  ;;  %v627_v38 = vpop.f32.mrf.mxu0 }
 0x100   : > { %1343 = vst [vmem:[%s2076_s7 + $0x2c] sm:$0xf] %v1648_v33  ;;  %v1653_v39 = vpack.c.bf16 %v636_v34, %v636_v34  ;;  %v628_v40 = vadd.f32 %v2064_v48, %v627_v38  ;;  %v955_v41 = vpop.f32.mrf.mxu1 }
 0x101   : > { %1183 = vst [vmem:[%s2076_s7 + $0x28] sm:$0xf] %v1616_v36  ;;  %v1621_v42 = vpack.c.bf16 %v964_v37, %v964_v37  ;;  %v956_v43 = vadd.f32 %v2070_v49, %v955_v41  ;;  %v1750_v44 = vpop.f32.mrf.mxu0 }
 0x102   : > { %1348 = vst [vmem:[%s2076_s7 + $0x54] sm:$0xf] %v1653_v39  ;;  %v1651_v45 = vpack.c.bf16 %v628_v40, %v628_v40  ;;  %v639_v46 = vadd.f32 %v1750_v44, %v2064_v48  ;;  %v1798_v47 = vpop.f32.mrf.mxu1 }
 0x103   : > { %1188 = vst [vmem:[%s2076_s7 + $0x50] sm:$0xf] %v1621_v42  ;;  %v1619_v50 = vpack.c.bf16 %v956_v43, %v956_v43  ;;  %v967_v51 = vadd.f32 %v1798_v47, %v2070_v49  ;;  %v630_v52 = vpop.f32.mrf.mxu0 }
 0x104   : > { %1346 = vst [vmem:[%s2076_s7 + $0x44] sm:$0xf] %v1651_v45  ;;  %v1654_v53 = vpack.c.bf16 %v639_v46, %v639_v46  ;;  %v631_v54 = vadd.f32 %v2064_v48, %v630_v52  ;;  %v958_v55 = vpop.f32.mrf.mxu1 }
 0x105   : > { %1186 = vst [vmem:[%s2076_s7 + $0x40] sm:$0xf] %v1619_v50  ;;  %v1622_v56 = vpack.c.bf16 %v967_v51, %v967_v51  ;;  %v959_v57 = vadd.f32 %v2070_v49, %v958_v55  ;;  %v1753_v58 = vpop.f32.mrf.mxu0 }
 0x106   : > { %1349 = vst [vmem:[%s2076_s7 + $0x5c] sm:$0xf] %v1654_v53  ;;  %v1652_v59 = vpack.c.bf16 %v631_v54, %v631_v54  ;;  %v652_v60 = vadd.f32 %v1753_v58, %v2064_v48  ;;  %v1801_v61 = vpop.f32.mrf.mxu1 }
 0x107   : > { %1189 = vst [vmem:[%s2076_s7 + $0x58] sm:$0xf] %v1622_v56  ;;  %v1620_v62 = vpack.c.bf16 %v959_v57, %v959_v57  ;;  %v980_v63 = vadd.f32 %v1801_v61, %v2070_v49  ;;  %v643_v0 = vpop.f32.mrf.mxu0 }
 0x108   : > { %1347 = vst [vmem:[%s2076_s7 + $0x4c] sm:$0xf] %v1652_v59  ;;  %v1657_v1 = vpack.c.bf16 %v652_v60, %v652_v60  ;;  %v644_v2 = vadd.f32 %v2064_v48, %v643_v0  ;;  %v971_v3 = vpop.f32.mrf.mxu1 }
 0x109   : > { %1187 = vst [vmem:[%s2076_s7 + $0x48] sm:$0xf] %v1620_v62  ;;  %v1625_v4 = vpack.c.bf16 %v980_v63, %v980_v63  ;;  %v972_v5 = vadd.f32 %v2070_v49, %v971_v3  ;;  %v1754_v6 = vpop.f32.mrf.mxu0 }
 0x10a   : > { %1352 = vst [vmem:[%s2076_s7 + $0x74] sm:$0xf] %v1657_v1  ;;  %v1655_v7 = vpack.c.bf16 %v644_v2, %v644_v2  ;;  %v655_v8 = vadd.f32 %v1754_v6, %v2064_v48  ;;  %v1802_v9 = vpop.f32.mrf.mxu1 }
 0x10b   : > { %1192 = vst [vmem:[%s2076_s7 + $0x70] sm:$0xf] %v1625_v4  ;;  %v1623_v10 = vpack.c.bf16 %v972_v5, %v972_v5  ;;  %v983_v11 = vadd.f32 %v1802_v9, %v2070_v49  ;;  %v646_v12 = vpop.f32.mrf.mxu0 }
 0x10c   : > { %1350 = vst [vmem:[%s2076_s7 + $0x64] sm:$0xf] %v1655_v7  ;;  %v1658_v13 = vpack.c.bf16 %v655_v8, %v655_v8  ;;  %v647_v14 = vadd.f32 %v2064_v48, %v646_v12  ;;  %v974_v15 = vpop.f32.mrf.mxu1 }
 0x10d   : > { %1190 = vst [vmem:[%s2076_s7 + $0x60] sm:$0xf] %v1623_v10  ;;  %v1626_v16 = vpack.c.bf16 %v983_v11, %v983_v11  ;;  %v975_v17 = vadd.f32 %v2070_v49, %v974_v15  ;;  %v1757_v18 = vpop.f32.mrf.mxu0 }
 0x10e   : > { %1353 = vst [vmem:[%s2076_s7 + $0x7c] sm:$0xf] %v1658_v13  ;;  %v1656_v19 = vpack.c.bf16 %v647_v14, %v647_v14  ;;  %v668_v20 = vadd.f32 %v1757_v18, %v2064_v48  ;;  %v1805_v21 = vpop.f32.mrf.mxu1 }
 0x10f   : > { %1193 = vst [vmem:[%s2076_s7 + $0x78] sm:$0xf] %v1626_v16  ;;  %v1624_v22 = vpack.c.bf16 %v975_v17, %v975_v17  ;;  %v996_v23 = vadd.f32 %v1805_v21, %v2070_v49  ;;  %v659_v24 = vpop.f32.mrf.mxu0 }
 0x110   : > { %1351 = vst [vmem:[%s2076_s7 + $0x6c] sm:$0xf] %v1656_v19  ;;  %v1661_v25 = vpack.c.bf16 %v668_v20, %v668_v20  ;;  %v660_v26 = vadd.f32 %v2064_v48, %v659_v24  ;;  %v987_v27 = vpop.f32.mrf.mxu1 }
 0x111   : > { %1191 = vst [vmem:[%s2076_s7 + $0x68] sm:$0xf] %v1624_v22  ;;  %v1629_v28 = vpack.c.bf16 %v996_v23, %v996_v23  ;;  %v988_v29 = vadd.f32 %v2070_v49, %v987_v27  ;;  %v1758_v30 = vpop.f32.mrf.mxu0 }
 0x112   : > { %1356 = vst [vmem:[%s2076_s7 + $0x94] sm:$0xf] %v1661_v25  ;;  %v1659_v31 = vpack.c.bf16 %v660_v26, %v660_v26  ;;  %v671_v32 = vadd.f32 %v1758_v30, %v2064_v48  ;;  %v1806_v33 = vpop.f32.mrf.mxu1 }
 0x113   : > { %1196 = vst [vmem:[%s2076_s7 + $0x90] sm:$0xf] %v1629_v28  ;;  %v1627_v34 = vpack.c.bf16 %v988_v29, %v988_v29  ;;  %v999_v35 = vadd.f32 %v1806_v33, %v2070_v49  ;;  %v662_v36 = vpop.f32.mrf.mxu0 }
 0x114   : > { %1354 = vst [vmem:[%s2076_s7 + $0x84] sm:$0xf] %v1659_v31  ;;  %v1662_v37 = vpack.c.bf16 %v671_v32, %v671_v32  ;;  %v663_v38 = vadd.f32 %v2064_v48, %v662_v36  ;;  %v990_v39 = vpop.f32.mrf.mxu1 }
 0x115   : > { %1194 = vst [vmem:[%s2076_s7 + $0x80] sm:$0xf] %v1627_v34  ;;  %v1630_v40 = vpack.c.bf16 %v999_v35, %v999_v35  ;;  %v991_v41 = vadd.f32 %v2070_v49, %v990_v39  ;;  %v1761_v42 = vpop.f32.mrf.mxu0 }
 0x116   : > { %1357 = vst [vmem:[%s2076_s7 + $0x9c] sm:$0xf] %v1662_v37  ;;  %v1660_v43 = vpack.c.bf16 %v663_v38, %v663_v38  ;;  %v684_v44 = vadd.f32 %v1761_v42, %v2064_v48  ;;  %v1809_v45 = vpop.f32.mrf.mxu1 }
 0x117   : > { %1197 = vst [vmem:[%s2076_s7 + $0x98] sm:$0xf] %v1630_v40  ;;  %v1628_v46 = vpack.c.bf16 %v991_v41, %v991_v41  ;;  %v1012_v47 = vadd.f32 %v1809_v45, %v2070_v49  ;;  %v675_v50 = vpop.f32.mrf.mxu0 }
 0x118   : > { %1355 = vst [vmem:[%s2076_s7 + $0x8c] sm:$0xf] %v1660_v43  ;;  %v1665_v51 = vpack.c.bf16 %v684_v44, %v684_v44  ;;  %v676_v52 = vadd.f32 %v2064_v48, %v675_v50  ;;  %v1003_v53 = vpop.f32.mrf.mxu1 }
 0x119   : > { %1195 = vst [vmem:[%s2076_s7 + $0x88] sm:$0xf] %v1628_v46  ;;  %v1633_v54 = vpack.c.bf16 %v1012_v47, %v1012_v47  ;;  %v1004_v55 = vadd.f32 %v2070_v49, %v1003_v53  ;;  %v1762_v56 = vpop.f32.mrf.mxu0 }
 0x11a   : > { %1360 = vst [vmem:[%s2076_s7 + $0xb4] sm:$0xf] %v1665_v51  ;;  %v1663_v57 = vpack.c.bf16 %v676_v52, %v676_v52  ;;  %v687_v58 = vadd.f32 %v1762_v56, %v2064_v48  ;;  %v1810_v59 = vpop.f32.mrf.mxu1 }
 0x11b   : > { %1200 = vst [vmem:[%s2076_s7 + $0xb0] sm:$0xf] %v1633_v54  ;;  %v1631_v60 = vpack.c.bf16 %v1004_v55, %v1004_v55  ;;  %v1015_v61 = vadd.f32 %v1810_v59, %v2070_v49  ;;  %v678_v62 = vpop.f32.mrf.mxu0 }
 0x11c   : > { %1358 = vst [vmem:[%s2076_s7 + $0xa4] sm:$0xf] %v1663_v57  ;;  %v1666_v63 = vpack.c.bf16 %v687_v58, %v687_v58  ;;  %v679_v0 = vadd.f32 %v2064_v48, %v678_v62  ;;  %v1006_v1 = vpop.f32.mrf.mxu1 }
 0x11d   : > { %1198 = vst [vmem:[%s2076_s7 + $0xa0] sm:$0xf] %v1631_v60  ;;  %v1634_v2 = vpack.c.bf16 %v1015_v61, %v1015_v61  ;;  %v1007_v3 = vadd.f32 %v2070_v49, %v1006_v1  ;;  %v1765_v4 = vpop.f32.mrf.mxu0 }
 0x11e   : > { %1361 = vst [vmem:[%s2076_s7 + $0xbc] sm:$0xf] %v1666_v63  ;;  %v1664_v5 = vpack.c.bf16 %v679_v0, %v679_v0  ;;  %v700_v6 = vadd.f32 %v1765_v4, %v2064_v48  ;;  %v1813_v7 = vpop.f32.mrf.mxu1 }
 0x11f   : > { %1201 = vst [vmem:[%s2076_s7 + $0xb8] sm:$0xf] %v1634_v2  ;;  %v1632_v8 = vpack.c.bf16 %v1007_v3, %v1007_v3  ;;  %v1028_v9 = vadd.f32 %v1813_v7, %v2070_v49  ;;  %v691_v10 = vpop.f32.mrf.mxu0 }
 0x120   : > { %1359 = vst [vmem:[%s2076_s7 + $0xac] sm:$0xf] %v1664_v5  ;;  %v1669_v11 = vpack.c.bf16 %v700_v6, %v700_v6  ;;  %v692_v12 = vadd.f32 %v2064_v48, %v691_v10  ;;  %v1019_v13 = vpop.f32.mrf.mxu1 }
 0x121   : > { %1199 = vst [vmem:[%s2076_s7 + $0xa8] sm:$0xf] %v1632_v8  ;;  %v1637_v14 = vpack.c.bf16 %v1028_v9, %v1028_v9  ;;  %v1020_v15 = vadd.f32 %v2070_v49, %v1019_v13  ;;  %v1766_v16 = vpop.f32.mrf.mxu0 }
 0x122   : > { %1364 = vst [vmem:[%s2076_s7 + $0xd4] sm:$0xf] %v1669_v11  ;;  %v1667_v17 = vpack.c.bf16 %v692_v12, %v692_v12  ;;  %v703_v18 = vadd.f32 %v1766_v16, %v2064_v48  ;;  %v1814_v19 = vpop.f32.mrf.mxu1 }
 0x123   : > { %1204 = vst [vmem:[%s2076_s7 + $0xd0] sm:$0xf] %v1637_v14  ;;  %v1635_v20 = vpack.c.bf16 %v1020_v15, %v1020_v15  ;;  %v1031_v21 = vadd.f32 %v1814_v19, %v2070_v49  ;;  %v694_v22 = vpop.f32.mrf.mxu0 }
 0x124   : > { %1362 = vst [vmem:[%s2076_s7 + $0xc4] sm:$0xf] %v1667_v17  ;;  %v1670_v23 = vpack.c.bf16 %v703_v18, %v703_v18  ;;  %v695_v24 = vadd.f32 %v2064_v48, %v694_v22  ;;  %v1022_v25 = vpop.f32.mrf.mxu1 }
 0x125   : > { %1202 = vst [vmem:[%s2076_s7 + $0xc0] sm:$0xf] %v1635_v20  ;;  %v1638_v26 = vpack.c.bf16 %v1031_v21, %v1031_v21  ;;  %v1023_v27 = vadd.f32 %v2070_v49, %v1022_v25  ;;  %v1769_v28 = vpop.f32.mrf.mxu0 }
 0x126   : > { %1365 = vst [vmem:[%s2076_s7 + $0xdc] sm:$0xf] %v1670_v23  ;;  %v1668_v29 = vpack.c.bf16 %v695_v24, %v695_v24  ;;  %v716_v30 = vadd.f32 %v1769_v28, %v2064_v48  ;;  %v1817_v31 = vpop.f32.mrf.mxu1 }
 0x127   : > { %1205 = vst [vmem:[%s2076_s7 + $0xd8] sm:$0xf] %v1638_v26  ;;  %v1636_v32 = vpack.c.bf16 %v1023_v27, %v1023_v27  ;;  %v1044_v33 = vadd.f32 %v1817_v31, %v2070_v49  ;;  %v707_v34 = vpop.f32.mrf.mxu0 }
 0x128   : > { %1363 = vst [vmem:[%s2076_s7 + $0xcc] sm:$0xf] %v1668_v29  ;;  %v1673_v35 = vpack.c.bf16 %v716_v30, %v716_v30  ;;  %v708_v36 = vadd.f32 %v2064_v48, %v707_v34  ;;  %v1035_v37 = vpop.f32.mrf.mxu1 }
 0x129   : > { %1203 = vst [vmem:[%s2076_s7 + $0xc8] sm:$0xf] %v1636_v32  ;;  %v1641_v38 = vpack.c.bf16 %v1044_v33, %v1044_v33  ;;  %v1036_v39 = vadd.f32 %v2070_v49, %v1035_v37  ;;  %v1770_v40 = vpop.f32.mrf.mxu0 }
 0x12a   : > { %1368 = vst [vmem:[%s2076_s7 + $0xf4] sm:$0xf] %v1673_v35  ;;  %v1671_v41 = vpack.c.bf16 %v708_v36, %v708_v36  ;;  %v719_v42 = vadd.f32 %v1770_v40, %v2064_v48  ;;  %v1818_v43 = vpop.f32.mrf.mxu1 }
 0x12b   : > { %1208 = vst [vmem:[%s2076_s7 + $0xf0] sm:$0xf] %v1641_v38  ;;  %v1639_v44 = vpack.c.bf16 %v1036_v39, %v1036_v39  ;;  %v1047_v45 = vadd.f32 %v1818_v43, %v2070_v49  ;;  %v710_v46 = vpop.f32.mrf.mxu0 }
 0x12c   : > { %1366 = vst [vmem:[%s2076_s7 + $0xe4] sm:$0xf] %v1671_v41  ;;  %v1674_v47 = vpack.c.bf16 %v719_v42, %v719_v42  ;;  %v711_v50 = vadd.f32 %v2064_v48, %v710_v46  ;;  %v1038_v51 = vpop.f32.mrf.mxu1 }
 0x12d   : > { %1206 = vst [vmem:[%s2076_s7 + $0xe0] sm:$0xf] %v1639_v44  ;;  %v1642_v52 = vpack.c.bf16 %v1047_v45, %v1047_v45  ;;  %v1039_v53 = vadd.f32 %v2070_v49, %v1038_v51 }
 0x12e   : > { %1369 = vst [vmem:[%s2076_s7 + $0xfc] sm:$0xf] %v1674_v47  ;;  %v1672_v54 = vpack.c.bf16 %v711_v50, %v711_v50 }
 0x12f   : > { %1209 = vst [vmem:[%s2076_s7 + $0xf8] sm:$0xf] %v1642_v52  ;;  %v1640_v55 = vpack.c.bf16 %v1039_v53, %v1039_v53 }
 0x130   : > { %1367 = vst [vmem:[%s2076_s7 + $0xec] sm:$0xf] %v1672_v54 }
 0x131   : > { %1207 = vst [vmem:[%s2076_s7 + $0xe8] sm:$0xf] %v1640_v55 }
 0x132 PF: > { %s16_s23 = sadd.s32 1, %s1913_s23   ;;  %s2221_s21 = smov %s1909_s22 }
 0x133   : > { %p13_p5 = scmp.ge.s32.totalorder %s16_s23, 4   ;;  %s2222_s22 = smov %s2224_s24 }
 0x135   :  { %15 = sbr.rel (!%p13_p5) target bundleno = 2 (0x2), region = 77 }

// kernel: bca_forward.3
= control target key start
LH: loop header
LB: loop body
LE: loop exit
PB: predicated region body
PF: predicated region fallthrough
CT: control target
= control target key end

     0   :  { %s2939_s21 = smov 0   ;;  %s2941_s22 = smov 0   ;;  %s3618_s0 = inlined_call_operand.vmem [shape: f32[2,256,128], index: 0, kind: input, shape index: {}]   ;;  %s3619_s1 = inlined_call_operand.vmem [shape: bf16[2,256,256], index: 1, kind: input, shape index: {}]   ;;  %s3620_s2 = inlined_call_operand.vmem [shape: bf16[128,128], index: 2, kind: input, shape index: {}]   ;;  %s3621_s3 = inlined_call_operand.vmem [shape: f32[1,128], index: 3, kind: input, shape index: {}]   ;;  %s3622_s4 = inlined_call_operand.vmem [shape: bf16[128,128], index: 4, kind: input, shape index: {}]   ;;  %s3623_s5 = inlined_call_operand.vmem [shape: f32[1,128], index: 5, kind: input, shape index: {}]   ;;  %s3624_s6 = inlined_call_operand.vmem [shape: f32[2,256,128], index: 6, kind: output, shape index: {}]  }
   0x1   :  { %s2943_s23 = smov 0   ;;  %s2945_s24 = smov 0  }
   0x2   :  { %s2947_s25 = smov 0  }
   0x3 LB: > { %s31_s26 = sadd.s32 1, %s2891_s23  ;;  %s35_s27 = sadd.s32 1, %s2895_s24  ;;  %s2899_s25 = sphi %s2947_s25, %s16_s25   ;;  %s2895_s24 = sphi %s2945_s24, %s3683_s24   ;;  %s2891_s23 = sphi %s2943_s23, %s3682_s23   ;;  %s2887_s22 = sphi %s2941_s22, %s3681_s22   ;;  %s2883_s21 = sphi %s2939_s21, %s3680_s21  }
   0x4   : > { %p33_p0 = scmp.ge.s32.totalorder %s31_s26, 2  ;;  %p2275_p1 = scmp.ge.s32.totalorder %s2899_s25, 1 }
   0x5   : > { %p258_p2 = scmp.lt.s32.totalorder %s2899_s25, 5 }
   0x6   : > { %s3685_s26 = smov (%p33_p0, %s31_s26), 0  ;;  %s3687_s27 = smov (!%p33_p0, %s35_s27), %s2895_s24 }
   0x7   : > { %p259_p3 = pnand %p2275_p1, %p258_p2  ;;  %p37_p4 = scmp.ge.s32.totalorder %s3687_s27, 2 }
   0x9   : > { %s3689_s27 = smov (%p37_p4, %s3687_s27), 0  ;;  %262 = sbr.rel (%p259_p3) target bundleno = 1295 (0x50f), region = 44 }
   0xe   : > { %v2677_v0 = vld [vmem:[%s3620_s2 + $0x38] sm:$0xff]   ;;  %s2276_s30 = sshll.u32 %s2883_s21, 4  ;;  %v2678_v1 = vld [vmem:[%s3620_s2 + $0x30] sm:$0xff]   ;;  %p307_p5 = scmp.lt.s32.totalorder %s2887_s22, 1  ;;  %v2679_v2 = vld [vmem:[%s3620_s2 + $0x28] sm:$0xff]   ;;  %vm342_vm0 = vcmask 7168  }
   0xf   : > { %2552 = vmatprep.subr.bf16.mxu0 %v2677_v0  ;;  %p309_p6 = scmp.lt.s32.totalorder %s2276_s30, 31  ;;  %v2680_v3 = vld [vmem:[%s3620_s2 + $0x20] sm:$0xff]   ;;  %v2681_v8 = vld [vmem:[%s3620_s2 + $0x18] sm:$0xff]   ;;  %v2682_v9 = vld [vmem:[%s3620_s2 + $0x10] sm:$0xff]  }
  0x10   : > { %2553 = vmatpush3.bf16.msra.mxu0 %v2677_v0  ;;  %s3691_s22 = smov (!%p307_p5, %s2887_s22), 1  ;;  %v2683_v12 = vld [vmem:[%s3620_s2 + $0x8] sm:$0xff]   ;;  %v2684_v15 = vld [vmem:[%s3620_s2] sm:$0xff]  }
  0x11   : > { %2554 = vmatprep.subr.bf16.mxu0 %v2678_v1  ;;  %s3693_s30 = smov (!%p309_p6, %s2276_s30), 31  ;;  %s2277_s11 = sshll.u32 %s3691_s22, 5  ;;  %v2284_v49 = vld [vmem:[%s3621_s3] ss:$0 sm:$0xff] }
  0x12   : > { %s2978_s12 = sadd.s32 %s2277_s11, %s3693_s30  ;;  %s2360_s13 = sshll.u32 %s3691_s22, 8 }
  0x13   : > { %s2278_s16 = sshll.u32 %s2978_s12, 3  ;;  %s2987_s19 = scalar_lea.vmem %s3619_s1, %s2360_s13 }
  0x14   : > { %2555 = vmatpush3.bf16.msra.mxu0 %v2678_v1  ;;  %s2994_s22 = scalar_lea.vmem %s3618_s0, %s2278_s16  ;;  %v2685_v4 = vld [vmem:[%s2987_s19 + $0xf0] ss:$8 sps:$4 sm:$0xff]   ;;  %v2687_v11 = vld [vmem:[%s2987_s19 + $0xe0] ss:$8 sps:$4 sm:$0xff]   ;;  %s3555_s20 = scalar_lea.vmem %s3624_s6, %s2278_s16 }
  0x15   : > { %2556 = vmatprep.subr.bf16.mxu0 %v2679_v2  ;;  %v391_v5 = vld [vmem:[%s2994_s22] sm:$0xff]  ;;  %v392_v6 = vld [vmem:[%s2994_s22 + $0x8] sm:$0xff]  ;;  %2440 = vmatprep.subr.bf16.mxu1 %v2685_v4  ;;  %v2686_v10 = vld [vmem:[%s2987_s19 + $0x70] ss:$8 sps:$4 sm:$0xff]  }
  0x16   : > { %v407_v7 = vpack.c.bf16 %v392_v6, %v391_v5  ;;  %2441 = vmatpush3.bf16.xpose.msra.mxu1 %v2686_v10  ;;  %v2688_v13 = vld [vmem:[%s2987_s19 + $0x60] ss:$8 sps:$4 sm:$0xff]   ;;  %v2689_v14 = vld [vmem:[%s2987_s19 + $0xd0] ss:$8 sps:$4 sm:$0xff]  }
  0x17   : > { %2442 = vmatprep.subr.bf16.mxu1 %v2687_v11  ;;  %v393_v16 = vld [vmem:[%s2994_s22 + $0x10] sm:$0xff]  ;;  %v394_v17 = vld [vmem:[%s2994_s22 + $0x18] sm:$0xff]  ;;  %v395_v18 = vld [vmem:[%s2994_s22 + $0x20] sm:$0xff] }
  0x18   : > { %2557 = vmatpush3.bf16.msra.mxu0 %v2679_v2  ;;  %2568 = vmatprep.mubr.bf16.mxu0 %v407_v7  ;;  %v396_v19 = vld [vmem:[%s2994_s22 + $0x28] sm:$0xff]  ;;  %v2690_v20 = vld [vmem:[%s2987_s19 + $0x50] ss:$8 sps:$4 sm:$0xff]   ;;  %v408_v22 = vpack.c.bf16 %v394_v17, %v393_v16  ;;  %v399_v26 = vld [vmem:[%s2994_s22 + $0x40] sm:$0xff] }
  0x19   : > { %2558 = vmatprep.subr.bf16.mxu0 %v2680_v3  ;;  %v2691_v21 = vld [vmem:[%s2987_s19 + $0xc0] ss:$8 sps:$4 sm:$0xff]   ;;  %v409_v23 = vpack.c.bf16 %v396_v19, %v395_v18  ;;  %v397_v24 = vld [vmem:[%s2994_s22 + $0x30] sm:$0xff]  ;;  %v398_v25 = vld [vmem:[%s2994_s22 + $0x38] sm:$0xff] }
  0x1a   : > { %v400_v27 = vld [vmem:[%s2994_s22 + $0x48] sm:$0xff]  ;;  %v2693_v29 = vld [vmem:[%s2987_s19 + $0xb0] ss:$8 sps:$4 sm:$0xff]   ;;  %v410_v30 = vpack.c.bf16 %v398_v25, %v397_v24  ;;  %v403_v34 = vld [vmem:[%s2994_s22 + $0x60] sm:$0xff] }
  0x1b   : > { %v2692_v28 = vld [vmem:[%s2987_s19 + $0x40] ss:$8 sps:$4 sm:$0xff]   ;;  %v411_v31 = vpack.c.bf16 %v400_v27, %v399_v26  ;;  %v401_v32 = vld [vmem:[%s2994_s22 + $0x50] sm:$0xff]  ;;  %v402_v33 = vld [vmem:[%s2994_s22 + $0x58] sm:$0xff] }
  0x1c   : > { %2559 = vmatpush3.bf16.msra.mxu0 %v2680_v3  ;;  %v404_v35 = vld [vmem:[%s2994_s22 + $0x68] sm:$0xff]  ;;  %v2694_v36 = vld [vmem:[%s2987_s19 + $0x30] ss:$8 sps:$4 sm:$0xff]   ;;  %v412_v37 = vpack.c.bf16 %v402_v33, %v401_v32  ;;  %v2901_v33 = vmov -inf  }
  0x1d   : > { %2560 = vmatprep.subr.bf16.mxu0 %v2681_v8  ;;  %v2695_v38 = vld [vmem:[%s2987_s19 + $0xa0] ss:$8 sps:$4 sm:$0xff]   ;;  %v413_v39 = vpack.c.bf16 %v404_v35, %v403_v34  ;;  %v405_v40 = vld [vmem:[%s2994_s22 + $0x70] sm:$0xff]  ;;  %v406_v41 = vld [vmem:[%s2994_s22 + $0x78] sm:$0xff]  ;;  %343 = vst.msk [vmem:[#allocation2] sm:$0xff] %vm342_vm0, %v2901_v33 }
  0x1e   : > { %2443 = vmatpush3.bf16.xpose.msra.mxu1 %v2688_v13  ;;  %v2696_v42 = vld [vmem:[%s2987_s19 + $0x20] ss:$8 sps:$4 sm:$0xff]   ;;  %v414_v43 = vpack.c.bf16 %v406_v41, %v405_v40  ;;  %v2697_v44 = vld [vmem:[%s2987_s19 + $0x90] ss:$8 sps:$4 sm:$0xff]   ;;  %344 = vst.msk [vmem:[#allocation2 + $0x8] sm:$0xff] %vm342_vm0, %v2901_v33  ;;  %345 = vst.msk [vmem:[#allocation2 + $0x10] sm:$0xff] %vm342_vm0, %v2901_v33 }
  0x1f   : > { %2444 = vmatprep.subr.bf16.mxu1 %v2689_v14  ;;  %v2698_v45 = vld [vmem:[%s2987_s19 + $0x10] ss:$8 sps:$4 sm:$0xff]   ;;  %v2699_v46 = vld [vmem:[%s2987_s19 + $0x80] ss:$8 sps:$4 sm:$0xff]   ;;  %346 = vst.msk [vmem:[#allocation2 + $0x18] sm:$0xff] %vm342_vm0, %v2901_v33  ;;  %347 = vst.msk [vmem:[#allocation2 + $0x20] sm:$0xff] %vm342_vm0, %v2901_v33 }
  0x20   : > { %2561 = vmatpush3.bf16.msra.mxu0 %v2681_v8  ;;  %v2700_v47 = vld [vmem:[%s2987_s19] ss:$8 sps:$4 sm:$0xff]   ;;  %348 = vst.msk [vmem:[#allocation2 + $0x28] sm:$0xff] %vm342_vm0, %v2901_v33  ;;  %349 = vst.msk [vmem:[#allocation2 + $0x30] sm:$0xff] %vm342_vm0, %v2901_v33 }
  0x21   : > { %2562 = vmatprep.subr.bf16.mxu0 %v2682_v9  ;;  %350 = vst.msk [vmem:[#allocation2 + $0x38] sm:$0xff] %vm342_vm0, %v2901_v33  ;;  %351 = vst.msk [vmem:[#allocation2 + $0x40] sm:$0xff] %vm342_vm0, %v2901_v33 }
  0x22   : > { %352 = vst.msk [vmem:[#allocation2 + $0x48] sm:$0xff] %vm342_vm0, %v2901_v33  ;;  %353 = vst.msk [vmem:[#allocation2 + $0x50] sm:$0xff] %vm342_vm0, %v2901_v33 }
  0x23   : > { %354 = vst.msk [vmem:[#allocation2 + $0x58] sm:$0xff] %vm342_vm0, %v2901_v33  ;;  %355 = vst.msk [vmem:[#allocation2 + $0x60] sm:$0xff] %vm342_vm0, %v2901_v33 }
  0x24   : > { %2563 = vmatpush3.bf16.msra.mxu0 %v2682_v9  ;;  %356 = vst.msk [vmem:[#allocation2 + $0x68] sm:$0xff] %vm342_vm0, %v2901_v33  ;;  %357 = vst.msk [vmem:[#allocation2 + $0x70] sm:$0xff] %vm342_vm0, %v2901_v33 }
  0x25   : > { %2564 = vmatprep.subr.bf16.mxu0 %v2683_v12  ;;  %358 = vst.msk [vmem:[#allocation2 + $0x78] sm:$0xff] %vm342_vm0, %v2901_v33  ;;  %v2716_v33 = vld [vmem:[%s2987_s19 + $0x44] ss:$8 sps:$4 sm:$0xff]  }
  0x26   : > { %2445 = vmatpush3.bf16.xpose.msra.mxu1 %v2690_v20 }
  0x27   : > { %2446 = vmatprep.subr.bf16.mxu1 %v2691_v21 }
  0x28   : > { %2565 = vmatpush3.bf16.msra.mxu0 %v2683_v12 }
  0x29   : > { %2566 = vmatprep.subr.bf16.mxu0 %v2684_v15 }
  0x2c   : > { %2567 = vmatpush3.bf16.msra.mxu0 %v2684_v15 }
  0x2e   : > { %2447 = vmatpush3.bf16.xpose.msra.mxu1 %v2692_v28 }
  0x2f   : > { %2569 = vmatmul.mubr.bf16.vlgmr.msra.gmra.mxu0 %v408_v22  ;;  %2448 = vmatprep.subr.bf16.mxu1 %v2693_v29 }
  0x30   : > { %2572 = vmatprep.mubr.bf16.mxu0 %v409_v23 }
  0x36   : > { %2449 = vmatpush3.bf16.xpose.msra.mxu1 %v2694_v36 }
  0x37   : > { %2573 = vmatmul.mubr.bf16.gmra.mxu0 %v410_v30  ;;  %2450 = vmatprep.subr.bf16.mxu1 %v2695_v38 }
  0x38   : > { %2576 = vmatprep.mubr.bf16.mxu0 %v411_v31 }
  0x3e   : > { %2451 = vmatpush3.bf16.xpose.msra.mxu1 %v2696_v42 }
  0x3f   : > { %2577 = vmatmul.mubr.bf16.gmra.mxu0 %v412_v37  ;;  %2452 = vmatprep.subr.bf16.mxu1 %v2697_v44 }
  0x40   : > { %2580 = vmatprep.mubr.bf16.mxu0 %v413_v39 }
  0x46   : > { %2453 = vmatpush3.bf16.xpose.msra.mxu1 %v2698_v45 }
  0x47   : > { %2581 = vmatmul.mubr.bf16.gmra.mxu0 %v414_v43  ;;  %2454 = vmatprep.subr.bf16.mxu1 %v2699_v46 }
  0x4e   : > { %2455 = vmatpush3.bf16.xpose.msra.mxu1 %v2700_v47  ;;  %v2902_v47 = vmov 0  }
  0x4f   : > { %2675 = vset.pattern.permute.xlu0 %v2902_v47  ;;  %2676 = vset.pattern.permute.xlu1 %v2902_v47 }
  0xef   : > { %v2570_v48 = vpop.f32.mrf.mxu0 }
  0xf0   : > { %v529_v52 = vadd.f32 %v2570_v48, %v2284_v49 }
  0xf1   : > { %v520_v50 = vpop.f32.mrf.mxu0 }
  0xf2   : > { %v521_v55 = vadd.f32 %v2284_v49, %v520_v50 }
  0xf3   : > { %v2571_v51 = vpop.f32.mrf.mxu0 }
  0xf4   : > { %v532_v53 = vadd.f32 %v2571_v51, %v2284_v49 }
  0xf5   : > { %v523_v54 = vpop.f32.mrf.mxu0 }
  0xf6   : > { %v2385_v56 = vpack.c.bf16 %v532_v53, %v529_v52  ;;  %v524_v57 = vadd.f32 %v2284_v49, %v523_v54 }
  0xf7   : > { %v2574_v58 = vpop.f32.mrf.mxu0 }
  0xf8   : > { %2417 = vst [vmem:[#allocation5 + $0x8] sm:$0xff] %v2385_v56   ;;  %v2380_v59 = vpack.c.bf16 %v524_v57, %v521_v55  ;;  %v545_v61 = vadd.f32 %v2574_v58, %v2284_v49  ;;  %v2903_v57 = vmov 0.0  }
  0xf9   : > { %v536_v60 = vpop.f32.mrf.mxu0  ;;  %359 = vst.msk [vmem:[#allocation3] sm:$0xff] %vm342_vm0, %v2903_v57  ;;  %360 = vst.msk [vmem:[#allocation3 + $0x8] sm:$0xff] %vm342_vm0, %v2903_v57 }
  0xfa   : > { %2381 = vst [vmem:[#allocation5] sm:$0xff] %v2380_v59   ;;  %v537_v63 = vadd.f32 %v2284_v49, %v536_v60  ;;  %361 = vst.msk [vmem:[#allocation3 + $0x10] sm:$0xff] %vm342_vm0, %v2903_v57 }
  0xfb   : > { %v2575_v62 = vpop.f32.mrf.mxu0  ;;  %362 = vst.msk [vmem:[#allocation3 + $0x18] sm:$0xff] %vm342_vm0, %v2903_v57  ;;  %363 = vst.msk [vmem:[#allocation3 + $0x20] sm:$0xff] %vm342_vm0, %v2903_v57 }
  0xfc   : > { %v548_v0 = vadd.f32 %v2575_v62, %v2284_v49  ;;  %364 = vst.msk [vmem:[#allocation3 + $0x28] sm:$0xff] %vm342_vm0, %v2903_v57  ;;  %365 = vst.msk [vmem:[#allocation3 + $0x30] sm:$0xff] %vm342_vm0, %v2903_v57 }
  0xfd   : > { %v539_v1 = vpop.f32.mrf.mxu0  ;;  %366 = vst.msk [vmem:[#allocation3 + $0x38] sm:$0xff] %vm342_vm0, %v2903_v57  ;;  %367 = vst.msk [vmem:[#allocation3 + $0x40] sm:$0xff] %vm342_vm0, %v2903_v57 }
  0xfe   : > { %v2395_v2 = vpack.c.bf16 %v548_v0, %v545_v61  ;;  %v540_v3 = vadd.f32 %v2284_v49, %v539_v1  ;;  %368 = vst.msk [vmem:[#allocation3 + $0x48] sm:$0xff] %vm342_vm0, %v2903_v57  ;;  %369 = vst.msk [vmem:[#allocation3 + $0x50] sm:$0xff] %vm342_vm0, %v2903_v57 }
  0xff   : > { %v2578_v4 = vpop.f32.mrf.mxu0  ;;  %v2702_v9 = vld [vmem:[#allocation5 + $0x8] sm:$0xff]   ;;  %370 = vst.msk [vmem:[#allocation3 + $0x58] sm:$0xff] %vm342_vm0, %v2903_v57  ;;  %371 = vst.msk [vmem:[#allocation3 + $0x60] sm:$0xff] %vm342_vm0, %v2903_v57 }
 0x100   : > { %2419 = vst [vmem:[#allocation5 + $0x18] sm:$0xff] %v2395_v2   ;;  %v2390_v5 = vpack.c.bf16 %v540_v3, %v537_v63  ;;  %v561_v8 = vadd.f32 %v2578_v4, %v2284_v49  ;;  %372 = vst.msk [vmem:[#allocation3 + $0x68] sm:$0xff] %vm342_vm0, %v2903_v57 }
 0x101   : > { %v2701_v6 = vld [vmem:[#allocation5] sm:$0xff]   ;;  %v552_v7 = vpop.f32.mrf.mxu0  ;;  %373 = vst.msk [vmem:[#allocation3 + $0x70] sm:$0xff] %vm342_vm0, %v2903_v57  ;;  %374 = vst.msk [vmem:[#allocation3 + $0x78] sm:$0xff] %vm342_vm0, %v2903_v57  ;;  %v3312_v57 = vld [vmem:[#allocation2 + $0x68] sm:$0xff] }
 0x102   : > { %2418 = vst [vmem:[#allocation5 + $0x10] sm:$0xff] %v2390_v5   ;;  %2456 = vmatprep.mubr.bf16.mxu1 %v2701_v6  ;;  %v553_v11 = vadd.f32 %v2284_v49, %v552_v7  ;;  %3645 = vst [vmem:[#allocation13_spill] sm:$0xff] %v3312_v57 }
 0x103   : > { %v2579_v10 = vpop.f32.mrf.mxu0  ;;  %2457 = vmatmul.mubr.bf16.vlgmr.msra.gmra.mxu1 %v2701_v6 }
 0x104   : > { %v564_v12 = vadd.f32 %v2579_v10, %v2284_v49  ;;  %2458 = vmatprep.mubr.bf16.mxu1 %v2702_v9 }
 0x105   : > { %v555_v13 = vpop.f32.mrf.mxu0 }
 0x106   : > { %v2405_v14 = vpack.c.bf16 %v564_v12, %v561_v8  ;;  %v556_v15 = vadd.f32 %v2284_v49, %v555_v13 }
 0x107   : > { %v2582_v16 = vpop.f32.mrf.mxu0  ;;  %v2704_v28 = vld [vmem:[#allocation5 + $0x18] sm:$0xff]  }
 0x108   : > { %2421 = vst [vmem:[#allocation5 + $0x28] sm:$0xff] %v2405_v14   ;;  %v2400_v17 = vpack.c.bf16 %v556_v15, %v553_v11  ;;  %v577_v20 = vadd.f32 %v2582_v16, %v2284_v49 }
 0x109   : > { %v2703_v18 = vld [vmem:[#allocation5 + $0x10] sm:$0xff]   ;;  %v568_v19 = vpop.f32.mrf.mxu0 }
 0x10a   : > { %2420 = vst [vmem:[#allocation5 + $0x20] sm:$0xff] %v2400_v17   ;;  %v569_v22 = vadd.f32 %v2284_v49, %v568_v19 }
 0x10b   : > { %v2583_v21 = vpop.f32.mrf.mxu0  ;;  %2459 = vmatmul.mubr.bf16.gmra.mxu1 %v2702_v9 }
 0x10c   : > { %v580_v23 = vadd.f32 %v2583_v21, %v2284_v49  ;;  %2460 = vmatprep.mubr.bf16.mxu1 %v2703_v18  ;;  %v2710_v21 = vld [vmem:[%s2987_s19 + $0x74] ss:$8 sps:$4 sm:$0xff]  }
 0x10d   : > { %v571_v24 = vpop.f32.mrf.mxu0 }
 0x10e   : > { %v2415_v25 = vpack.c.bf16 %v580_v23, %v577_v20  ;;  %v572_v26 = vadd.f32 %v2284_v49, %v571_v24  ;;  %v2709_v20 = vld [vmem:[%s2987_s19 + $0xf4] ss:$8 sps:$4 sm:$0xff]   ;;  %v2712_v23 = vld [vmem:[%s2987_s19 + $0x64] ss:$8 sps:$4 sm:$0xff]  }
 0x10f   : > { %v2706_v30 = vld [vmem:[#allocation5 + $0x28] sm:$0xff]   ;;  %2472 = vmatprep.subr.bf16.mxu0 %v2709_v20  ;;  %2616 = vmatprep.subr.bf16.mxu1 %v2709_v20  ;;  %v3175_v24 = vld [vmem:[#allocation2] sm:$0xff] }
 0x110   : > { %2423 = vst [vmem:[#allocation5 + $0x38] sm:$0xff] %v2415_v25   ;;  %v2410_v27 = vpack.c.bf16 %v572_v26, %v569_v22  ;;  %v2711_v22 = vld [vmem:[%s2987_s19 + $0xe4] ss:$8 sps:$4 sm:$0xff]   ;;  %2473 = vmatpush3.bf16.msra.mxu0 %v2710_v21  ;;  %2624 = vmatpush3.bf16.msra.mxu1 %v2710_v21  ;;  %v2713_v25 = vld [vmem:[%s2987_s19 + $0xd4] ss:$8 sps:$4 sm:$0xff]  }
 0x111   : > { %v2705_v29 = vld [vmem:[#allocation5 + $0x20] sm:$0xff]   ;;  %2474 = vmatprep.subr.bf16.mxu0 %v2711_v22  ;;  %2617 = vmatprep.subr.bf16.mxu1 %v2711_v22  ;;  %v3230_v21 = vld [vmem:[#allocation2 + $0x28] sm:$0xff] }
 0x112   : > { %2422 = vst [vmem:[#allocation5 + $0x30] sm:$0xff] %v2410_v27   ;;  %v2714_v27 = vld [vmem:[%s2987_s19 + $0x54] ss:$8 sps:$4 sm:$0xff]   ;;  %v3302_v22 = vld [vmem:[#allocation2 + $0x60] sm:$0xff] }
 0x113   : > { %2461 = vmatmul.mubr.bf16.gmra.mxu1 %v2703_v18  ;;  %3643 = vst [vmem:[#allocation11_spill] sm:$0xff] %v3302_v22 }
 0x114   : > { %2462 = vmatprep.mubr.bf16.mxu1 %v2704_v28  ;;  %2475 = vmatpush3.bf16.msra.mxu0 %v2712_v23 }
 0x115   : > { %2625 = vmatpush3.bf16.msra.mxu1 %v2712_v23  ;;  %2476 = vmatprep.subr.bf16.mxu0 %v2713_v25  ;;  %v2723_v23 = vld [vmem:[%s2987_s19 + $0x84] ss:$8 sps:$4 sm:$0xff]  }
 0x116   : > { %2618 = vmatprep.subr.bf16.mxu1 %v2713_v25 }
 0x117   : > { %v2708_v32 = vld [vmem:[#allocation5 + $0x38] sm:$0xff]  }
 0x118   : > { %2477 = vmatpush3.bf16.msra.mxu0 %v2714_v27 }
 0x119   : > { %v2707_v31 = vld [vmem:[#allocation5 + $0x30] sm:$0xff]   ;;  %2626 = vmatpush3.bf16.msra.mxu1 %v2714_v27 }
 0x11b   : > { %2463 = vmatmul.mubr.bf16.gmra.mxu1 %v2704_v28 }
 0x11c   : > { %2464 = vmatprep.mubr.bf16.mxu1 %v2705_v29 }
 0x123   : > { %2465 = vmatmul.mubr.bf16.gmra.mxu1 %v2705_v29  ;;  %v3182_v29 = vld [vmem:[#allocation2 + $0x8] sm:$0xff] }
 0x124   : > { %2466 = vmatprep.mubr.bf16.mxu1 %v2706_v30 }
 0x12b   : > { %2467 = vmatmul.mubr.bf16.gmra.mxu1 %v2706_v30 }
 0x12c   : > { %2468 = vmatprep.mubr.bf16.mxu1 %v2707_v31 }
 0x133   : > { %2469 = vmatmul.mubr.bf16.gmra.mxu1 %v2707_v31  ;;  %v2715_v31 = vld [vmem:[%s2987_s19 + $0xc4] ss:$8 sps:$4 sm:$0xff]  }
 0x134   : > { %2470 = vmatprep.mubr.bf16.mxu1 %v2708_v32  ;;  %2478 = vmatprep.subr.bf16.mxu0 %v2715_v31 }
 0x135   : > { %2619 = vmatprep.subr.bf16.mxu1 %v2715_v31  ;;  %2479 = vmatpush3.bf16.msra.mxu0 %v2716_v33  ;;  %v3242_v31 = vld [vmem:[#allocation2 + $0x30] sm:$0xff] }
 0x136   : > { %2627 = vmatpush3.bf16.msra.mxu1 %v2716_v33 }
 0x13b   : > { %2471 = vmatmul.mubr.bf16.gmra.mxu1 %v2708_v32 }
 0x1c3   : > { %v3059_v34 = vpop.f32.mrf.mxu1 }
 0x1c5   : > { %v3061_v35 = vpop.f32.mrf.mxu1 }
 0x1c6   : > { %v1016_v36 = vmax.f32 %v3059_v34, %v3061_v35 }
 0x1c7   : > { %v3065_v37 = vpop.f32.mrf.mxu1 }
 0x1c8   : > { %1017 = vmax.xlane.f32.xlu0 %v1016_v36 }
 0x1c9   : > { %v3067_v38 = vpop.f32.mrf.mxu1 }
 0x1ca   : > { %v1019_v39 = vmax.f32 %v3065_v37, %v3067_v38 }
 0x1cb   : > { %v3071_v40 = vpop.f32.mrf.mxu1 }
 0x1cc   : > { %1020 = vmax.xlane.f32.xlu0 %v1019_v39  ;;  %v3194_v39 = vld [vmem:[#allocation2 + $0x10] sm:$0xff] }
 0x1cd   : > { %v3073_v41 = vpop.f32.mrf.mxu1 }
 0x1ce   : > { %v1022_v42 = vmax.f32 %v3071_v40, %v3073_v41 }
 0x1cf   : > { %v3077_v43 = vpop.f32.mrf.mxu1 }
 0x1d0   : > { %1023 = vmax.xlane.f32.xlu1 %v1022_v42  ;;  %v3322_v42 = vld [vmem:[#allocation2 + $0x70] sm:$0xff] }
 0x1d1   : > { %v3079_v44 = vpop.f32.mrf.mxu1  ;;  %3647 = vst [vmem:[#allocation15_spill] sm:$0xff] %v3322_v42 }
 0x1d2   : > { %v1025_v45 = vmax.f32 %v3077_v43, %v3079_v44 }
 0x1d3   : > { %v3083_v46 = vpop.f32.mrf.mxu1 }
 0x1d4   : > { %1026 = vmax.xlane.f32.xlu1 %v1025_v45  ;;  %v2717_v45 = vld [vmem:[%s2987_s19 + $0xb4] ss:$8 sps:$4 sm:$0xff]  }
 0x1d5   : > { %v3085_v48 = vpop.f32.mrf.mxu1  ;;  %2480 = vmatprep.subr.bf16.mxu0 %v2717_v45  ;;  %2620 = vmatprep.subr.bf16.mxu1 %v2717_v45 }
 0x1d6   : > { %v1028_v49 = vmax.f32 %v3083_v46, %v3085_v48 }
 0x1d7   : > { %v3089_v50 = vpop.f32.mrf.mxu1 }
 0x1d8   : > { %1029 = vmax.xlane.f32.xlu0 %v1028_v49  ;;  %v2718_v49 = vld [vmem:[%s2987_s19 + $0x34] ss:$8 sps:$4 sm:$0xff]  }
 0x1d9   : > { %v3091_v51 = vpop.f32.mrf.mxu1  ;;  %2481 = vmatpush3.bf16.msra.mxu0 %v2718_v49  ;;  %2628 = vmatpush3.bf16.msra.mxu1 %v2718_v49  ;;  %v3292_v49 = vld [vmem:[#allocation2 + $0x58] sm:$0xff] }
 0x1da   : > { %v1031_v52 = vmax.f32 %v3089_v50, %v3091_v51  ;;  %3641 = vst [vmem:[#allocation9_spill] sm:$0xff] %v3292_v49 }
 0x1db   : > { %v3095_v53 = vpop.f32.mrf.mxu1 }
 0x1dc   : > { %1032 = vmax.xlane.f32.xlu1 %v1031_v52 }
 0x1dd   : > { %v3097_v54 = vpop.f32.mrf.mxu1 }
 0x1de   : > { %v1034_v55 = vmax.f32 %v3095_v53, %v3097_v54 }
 0x1df   : > { %v3101_v56 = vpop.f32.mrf.mxu1 }
 0x1e0   : > { %1035 = vmax.xlane.f32.xlu0 %v1034_v55  ;;  %v3206_v55 = vld [vmem:[#allocation2 + $0x18] sm:$0xff] }
 0x1e1   : > { %v3119_v58 = vpop.f32.mrf.mxu1 }
 0x1e2   : > { %v1037_v59 = vmax.f32 %v3101_v56, %v3119_v58 }
 0x1e3   : > { %v3123_v60 = vpop.f32.mrf.mxu1 }
 0x1e4   : > { %1038 = vmax.xlane.f32.xlu1 %v1037_v59  ;;  %v2719_v59 = vld [vmem:[%s2987_s19 + $0xa4] ss:$8 sps:$4 sm:$0xff]  }
 0x1e5   : > { %v3125_v61 = vpop.f32.mrf.mxu1  ;;  %2482 = vmatprep.subr.bf16.mxu0 %v2719_v59  ;;  %2621 = vmatprep.subr.bf16.mxu1 %v2719_v59 }
 0x1e6   : > { %v1040_v62 = vmax.f32 %v3123_v60, %v3125_v61 }
 0x1e7   : > { %v3129_v63 = vpop.f32.mrf.mxu1 }
 0x1e8   : > { %1041 = vmax.xlane.f32.xlu0 %v1040_v62 }
 0x1e9   : > { %v3131_v0 = vpop.f32.mrf.mxu1 }
 0x1ea   : > { %v1043_v1 = vmax.f32 %v3129_v63, %v3131_v0 }
 0x1eb   : > { %v3135_v2 = vpop.f32.mrf.mxu1 }
 0x1ec   : > { %1044 = vmax.xlane.f32.xlu1 %v1043_v1  ;;  %v2720_v1 = vld [vmem:[%s2987_s19 + $0x24] ss:$8 sps:$4 sm:$0xff]  }
 0x1ed   : > { %v3137_v3 = vpop.f32.mrf.mxu1  ;;  %2483 = vmatpush3.bf16.msra.mxu0 %v2720_v1  ;;  %2629 = vmatpush3.bf16.msra.mxu1 %v2720_v1  ;;  %v3262_v1 = vld [vmem:[#allocation2 + $0x40] sm:$0xff] }
 0x1ee   : > { %v1046_v4 = vmax.f32 %v3135_v2, %v3137_v3 }
 0x1ef   : > { %v3141_v5 = vpop.f32.mrf.mxu1 }
 0x1f0   : > { %1047 = vmax.xlane.f32.xlu0 %v1046_v4 }
 0x1f1   : > { %v3143_v6 = vpop.f32.mrf.mxu1 }
 0x1f2   : > { %v1049_v7 = vmax.f32 %v3141_v5, %v3143_v6 }
 0x1f3   : > { %v3147_v8 = vpop.f32.mrf.mxu1 }
 0x1f4   : > { %1050 = vmax.xlane.f32.xlu1 %v1049_v7  ;;  %v3218_v7 = vld [vmem:[#allocation2 + $0x20] sm:$0xff] }
 0x1f5   : > { %v3149_v9 = vpop.f32.mrf.mxu1 }
 0x1f6   : > { %v1052_v10 = vmax.f32 %v3147_v8, %v3149_v9 }
 0x1f7   : > { %v3153_v11 = vpop.f32.mrf.mxu1 }
 0x1f8   : > { %1053 = vmax.xlane.f32.xlu0 %v1052_v10 }
 0x1f9   : > { %v3155_v12 = vpop.f32.mrf.mxu1 }
 0x1fa   : > { %v1055_v13 = vmax.f32 %v3153_v11, %v3155_v12 }
 0x1fb   : > { %v3159_v14 = vpop.f32.mrf.mxu1 }
 0x1fc   : > { %1056 = vmax.xlane.f32.xlu1 %v1055_v13  ;;  %v2721_v13 = vld [vmem:[%s2987_s19 + $0x94] ss:$8 sps:$4 sm:$0xff]  }
 0x1fd   : > { %v3161_v15 = vpop.f32.mrf.mxu1  ;;  %2484 = vmatprep.subr.bf16.mxu0 %v2721_v13  ;;  %2622 = vmatprep.subr.bf16.mxu1 %v2721_v13 }
 0x1fe   : > { %v1058_v16 = vmax.f32 %v3159_v14, %v3161_v15 }
 0x1ff   : > { %v3165_v17 = vpop.f32.mrf.mxu1 }
 0x200   : > { %1059 = vmax.xlane.f32.xlu0 %v1058_v16 }
 0x201   : > { %v3167_v18 = vpop.f32.mrf.mxu1 }
 0x202   : > { %v1061_v19 = vmax.f32 %v3165_v17, %v3167_v18 }
 0x204   : > { %1062 = vmax.xlane.f32.xlu1 %v1061_v19  ;;  %v2722_v19 = vld [vmem:[%s2987_s19 + $0x14] ss:$8 sps:$4 sm:$0xff]  }
 0x205   : > { %2485 = vmatpush3.bf16.msra.mxu0 %v2722_v19  ;;  %2630 = vmatpush3.bf16.msra.mxu1 %v2722_v19 }
 0x206   : > { %2486 = vmatprep.subr.bf16.mxu0 %v2723_v23  ;;  %2623 = vmatprep.subr.bf16.mxu1 %v2723_v23  ;;  %v3272_v23 = vld [vmem:[#allocation2 + $0x48] sm:$0xff] }
 0x251   : > { %v1018_v26 = vpop.xlane.xlu0 %1017 }
 0x252   : > { %v3180_v28 = vmax.f32 %v3175_v24, %v1018_v26  ;;  %v2724_v26 = vld [vmem:[%s2987_s19 + $0x4] ss:$8 sps:$4 sm:$0xff]  }
 0x253   : > { %2487 = vmatpush3.bf16.msra.mxu0 %v2724_v26  ;;  %2631 = vmatpush3.bf16.msra.mxu1 %v2724_v26 }
 0x254   : > { %1770 = vst.msk [vmem:[#allocation2] sm:$0xff] %vm342_vm0, %v3180_v28  ;;  %1130 = vperm.xlu0 %2675, %v3180_v28  }
 0x255   : > { %v1021_v32 = vpop.xlane.xlu0 %1020 }
 0x256   : > { %v3192_v36 = vmax.f32 %v3182_v29, %v1021_v32 }
 0x258   : > { %1771 = vst.msk [vmem:[#allocation2 + $0x8] sm:$0xff] %vm342_vm0, %v3192_v36  ;;  %1135 = vperm.xlu1 %2676, %v3192_v36  }
 0x259   : > { %v1024_v47 = vpop.xlane.xlu1 %1023 }
 0x25a   : > { %v3204_v52 = vmax.f32 %v3194_v39, %v1024_v47  ;;  %v3252_v47 = vld [vmem:[#allocation2 + $0x38] sm:$0xff] }
 0x25c   : > { %1772 = vst.msk [vmem:[#allocation2 + $0x10] sm:$0xff] %vm342_vm0, %v3204_v52  ;;  %1140 = vperm.xlu1 %2676, %v3204_v52  }
 0x25d   : > { %v1027_v62 = vpop.xlane.xlu1 %1026 }
 0x25e   : > { %v3216_v4 = vmax.f32 %v3206_v55, %v1027_v62 }
 0x260   : > { %1773 = vst.msk [vmem:[#allocation2 + $0x18] sm:$0xff] %vm342_vm0, %v3216_v4  ;;  %1145 = vperm.xlu1 %2676, %v3216_v4  }
 0x261   : > { %v1030_v16 = vpop.xlane.xlu0 %1029 }
 0x262   : > { %v3228_v20 = vmax.f32 %v3218_v7, %v1030_v16 }
 0x264   : > { %1774 = vst.msk [vmem:[#allocation2 + $0x20] sm:$0xff] %vm342_vm0, %v3228_v20  ;;  %1150 = vperm.xlu1 %2676, %v3228_v20  }
 0x265   : > { %v1033_v25 = vpop.xlane.xlu1 %1032 }
 0x266   : > { %v3240_v27 = vmax.f32 %v3230_v21, %v1033_v25 }
 0x268   : > { %1775 = vst.msk [vmem:[#allocation2 + $0x28] sm:$0xff] %vm342_vm0, %v3240_v27  ;;  %1155 = vperm.xlu1 %2676, %v3240_v27  }
 0x269   : > { %v1036_v33 = vpop.xlane.xlu0 %1035 }
 0x26a   : > { %v3250_v45 = vmax.f32 %v3242_v31, %v1036_v33 }
 0x26c   : > { %1776 = vst.msk [vmem:[#allocation2 + $0x30] sm:$0xff] %vm342_vm0, %v3250_v45  ;;  %1160 = vperm.xlu1 %2676, %v3250_v45  }
 0x26d   : > { %v1039_v59 = vpop.xlane.xlu1 %1038 }
 0x26e   : > { %v3260_v62 = vmax.f32 %v3252_v47, %v1039_v59  ;;  %v3282_v59 = vld [vmem:[#allocation2 + $0x50] sm:$0xff] }
 0x26f   : > { %3639 = vst [vmem:[#allocation7_spill] sm:$0xff] %v3282_v59 }
 0x270   : > { %1777 = vst.msk [vmem:[#allocation2 + $0x38] sm:$0xff] %vm342_vm0, %v3260_v62  ;;  %1165 = vperm.xlu1 %2676, %v3260_v62  }
 0x271   : > { %v1042_v16 = vpop.xlane.xlu0 %1041 }
 0x272   : > { %v3270_v19 = vmax.f32 %v3262_v1, %v1042_v16 }
 0x274   : > { %1778 = vst.msk [vmem:[#allocation2 + $0x40] sm:$0xff] %vm342_vm0, %v3270_v19  ;;  %1170 = vperm.xlu1 %2676, %v3270_v19  }
 0x275   : > { %v1045_v26 = vpop.xlane.xlu1 %1044 }
 0x276   : > { %v3280_v33 = vmax.f32 %v3272_v23, %v1045_v26 }
 0x278   : > { %3638 = vst [vmem:[#allocation6_spill] sm:$0xff] %v3280_v33  ;;  %1779 = vst.msk [vmem:[#allocation2 + $0x48] sm:$0xff] %vm342_vm0, %v3280_v33  ;;  %1175 = vperm.xlu0 %2675, %v3280_v33  }
 0x279   : > { %v1048_v25 = vpop.xlane.xlu0 %1047 }
 0x27a   : > { %v3290_v13 = vmax.f32 %v3282_v59, %v1048_v25 }
 0x27c   : > { %3640 = vst [vmem:[#allocation8_spill] sm:$0xff] %v3290_v13  ;;  %1780 = vst.msk [vmem:[#allocation2 + $0x50] sm:$0xff] %vm342_vm0, %v3290_v13  ;;  %1180 = vperm.xlu1 %2676, %v3290_v13  }
 0x27d   : > { %v1051_v16 = vpop.xlane.xlu1 %1050 }
 0x27e   : > { %v3300_v32 = vmax.f32 %v3292_v49, %v1051_v16 }
 0x280   : > { %3642 = vst [vmem:[#allocation10_spill] sm:$0xff] %v3300_v32  ;;  %1781 = vst.msk [vmem:[#allocation2 + $0x58] sm:$0xff] %vm342_vm0, %v3300_v32  ;;  %1185 = vperm.xlu0 %2675, %v3300_v32   ;;  %v3332_v32 = vld [vmem:[#allocation2 + $0x78] sm:$0xff] }
 0x281   : > { %v1054_v26 = vpop.xlane.xlu0 %1053  ;;  %3649 = vst [vmem:[#allocation17_spill] sm:$0xff] %v3332_v32 }
 0x282   : > { %v3310_v10 = vmax.f32 %v3302_v22, %v1054_v26 }
 0x284   : > { %3644 = vst [vmem:[#allocation12_spill] sm:$0xff] %v3310_v10  ;;  %1782 = vst.msk [vmem:[#allocation2 + $0x60] sm:$0xff] %vm342_vm0, %v3310_v10  ;;  %1190 = vperm.xlu1 %2676, %v3310_v10  }
 0x285   : > { %v1057_v25 = vpop.xlane.xlu1 %1056 }
 0x286   : > { %v3320_v30 = vmax.f32 %v3312_v57, %v1057_v25 }
 0x288   : > { %3646 = vst [vmem:[#allocation14_spill] sm:$0xff] %v3320_v30  ;;  %1783 = vst.msk [vmem:[#allocation2 + $0x68] sm:$0xff] %vm342_vm0, %v3320_v30  ;;  %1195 = vperm.xlu0 %2675, %v3320_v30  }
 0x289   : > { %v1060_v16 = vpop.xlane.xlu0 %1059 }
 0x28a   : > { %v3330_v22 = vmax.f32 %v3322_v42, %v1060_v16 }
 0x28c   : > { %3648 = vst [vmem:[#allocation16_spill] sm:$0xff] %v3330_v22  ;;  %1784 = vst.msk [vmem:[#allocation2 + $0x70] sm:$0xff] %vm342_vm0, %v3330_v22  ;;  %1200 = vperm.xlu1 %2676, %v3330_v22  }
 0x28d   : > { %v1063_v26 = vpop.xlane.xlu1 %1062 }
 0x28e   : > { %v3340_v57 = vmax.f32 %v3332_v32, %v1063_v26 }
 0x290   : > { %3650 = vst [vmem:[#allocation18_spill] sm:$0xff] %v3340_v57  ;;  %1785 = vst.msk [vmem:[#allocation2 + $0x78] sm:$0xff] %vm342_vm0, %v3340_v57  ;;  %1205 = vperm.xlu0 %2675, %v3340_v57  }
 0x2cf   : > { %v1131_v16 = vpop.permute.xlu0 %1130 }
 0x2d0   : > { %v1208_v25 = vsub.f32 %v3059_v34, %v1131_v16  ;;  %v1209_v42 = vsub.f32 %v3061_v35, %v1131_v16 }
 0x2d2   : > { %v1240_v10 = vmul.f32 1.442695, %v1208_v25  ;;  %v1242_v49 = vmul.f32 1.442695, %v1209_v42 }
 0x2d3   : > { %v1136_v22 = vpop.permute.xlu1 %1135 }
 0x2d4   : > { %2733 = vpow2.f32 %v1240_v10  ;;  %v1210_v26 = vsub.f32 %v3065_v37, %v1136_v22  ;;  %v1211_v13 = vsub.f32 %v3067_v38, %v1136_v22 }
 0x2d5   : > { %2735 = vpow2.f32 %v1242_v49 }
 0x2d6   : > { %v1244_v30 = vmul.f32 1.442695, %v1210_v26  ;;  %v1246_v32 = vmul.f32 1.442695, %v1211_v13 }
 0x2d7   : > { %v1141_v59 = vpop.permute.xlu1 %1140 }
 0x2d8   : > { %2737 = vpow2.f32 %v1244_v30  ;;  %v1212_v57 = vsub.f32 %v3071_v40, %v1141_v59  ;;  %v1213_v33 = vsub.f32 %v3073_v41, %v1141_v59 }
 0x2d9   : > { %2739 = vpow2.f32 %v1246_v32 }
 0x2da   : > { %v1248_v34 = vmul.f32 1.442695, %v1212_v57  ;;  %v1250_v35 = vmul.f32 1.442695, %v1213_v33 }
 0x2db   : > { %v1146_v25 = vpop.permute.xlu1 %1145 }
 0x2dc   : > { %2741 = vpow2.f32 %v1248_v34  ;;  %v1214_v42 = vsub.f32 %v3077_v43, %v1146_v25  ;;  %v1215_v37 = vsub.f32 %v3079_v44, %v1146_v25 }
 0x2dd   : > { %2743 = vpow2.f32 %v1250_v35 }
 0x2de   : > { %v1252_v38 = vmul.f32 1.442695, %v1214_v42  ;;  %v1254_v10 = vmul.f32 1.442695, %v1215_v37 }
 0x2df   : > { %v1151_v22 = vpop.permute.xlu1 %1150 }
 0x2e0   : > { %2745 = vpow2.f32 %v1252_v38  ;;  %v1216_v30 = vsub.f32 %v3083_v46, %v1151_v22  ;;  %v1217_v40 = vsub.f32 %v3085_v48, %v1151_v22 }
 0x2e1   : > { %v2734_v49 = vpop.eup %2733  ;;  %2747 = vpow2.f32 %v1254_v10 }
 0x2e2   : > { %v2736_v41 = vpop.eup %2735  ;;  %v1256_v57 = vmul.f32 1.442695, %v1216_v30  ;;  %v1258_v32 = vmul.f32 1.442695, %v1217_v40 }
 0x2e3   : > { %v1156_v13 = vpop.permute.xlu1 %1155  ;;  %v1336_v33 = vadd.f32 %v2736_v41, %v2734_v49 }
 0x2e4   : > { %2749 = vpow2.f32 %v1256_v57  ;;  %v1218_v43 = vsub.f32 %v3089_v50, %v1156_v13  ;;  %v1219_v44 = vsub.f32 %v3091_v51, %v1156_v13 }
 0x2e5   : > { %v2738_v59 = vpop.eup %2737  ;;  %2751 = vpow2.f32 %v1258_v32  ;;  %1337 = vadd.xlane.f32.xlu1 %v1336_v33 }
 0x2e6   : > { %v2740_v16 = vpop.eup %2739  ;;  %v1260_v26 = vmul.f32 1.442695, %v1218_v43  ;;  %v1262_v46 = vmul.f32 1.442695, %v1219_v44  ;;  %v1529_v34 = vpack.c.bf16 %v2738_v59, %v2734_v49 }
 0x2e7   : > { %v1161_v48 = vpop.permute.xlu1 %1160  ;;  %v1530_v35 = vpack.c.bf16 %v2740_v16, %v2736_v41  ;;  %v1339_v25 = vadd.f32 %v2740_v16, %v2738_v59 }
 0x2e8   : > { %2753 = vpow2.f32 %v1260_v26  ;;  %v1220_v42 = vsub.f32 %v3095_v53, %v1161_v48  ;;  %v1221_v37 = vsub.f32 %v3097_v54, %v1161_v48 }
 0x2e9   : > { %v2742_v38 = vpop.eup %2741  ;;  %2755 = vpow2.f32 %v1262_v46  ;;  %1673 = vmatprep.mubr.bf16.mxu0 %v1530_v35  ;;  %1340 = vadd.xlane.f32.xlu0 %v1339_v25 }
 0x2ea   : > { %v2744_v50 = vpop.eup %2743  ;;  %v1264_v51 = vmul.f32 1.442695, %v1220_v42  ;;  %v1266_v10 = vmul.f32 1.442695, %v1221_v37  ;;  %1674 = vmatmul.mubr.bf16.vlgmr.msra.gmra.mxu0 %v1529_v34 }
 0x2eb   : > { %v1166_v22 = vpop.permute.xlu1 %1165  ;;  %v1342_v30 = vadd.f32 %v2744_v50, %v2742_v38 }
 0x2ec   : > { %2757 = vpow2.f32 %v1264_v51  ;;  %v1222_v40 = vsub.f32 %v3101_v56, %v1166_v22  ;;  %v1223_v49 = vsub.f32 %v3119_v58, %v1166_v22 }
 0x2ed   : > { %v2746_v41 = vpop.eup %2745  ;;  %2759 = vpow2.f32 %v1266_v10  ;;  %1343 = vadd.xlane.f32.xlu0 %v1342_v30 }
 0x2ee   : > { %v2748_v53 = vpop.eup %2747  ;;  %v1268_v54 = vmul.f32 1.442695, %v1222_v40  ;;  %v1270_v57 = vmul.f32 1.442695, %v1223_v49  ;;  %v1531_v32 = vpack.c.bf16 %v2746_v41, %v2742_v38 }
 0x2ef   : > { %v1171_v13 = vpop.permute.xlu1 %1170  ;;  %v1532_v33 = vpack.c.bf16 %v2748_v53, %v2744_v50  ;;  %v1345_v43 = vadd.f32 %v2748_v53, %v2746_v41 }
 0x2f0   : > { %2761 = vpow2.f32 %v1268_v54  ;;  %v1224_v44 = vsub.f32 %v3123_v60, %v1171_v13  ;;  %v1225_v59 = vsub.f32 %v3125_v61, %v1171_v13 }
 0x2f1   : > { %v2750_v16 = vpop.eup %2749  ;;  %2763 = vpow2.f32 %v1270_v57  ;;  %1681 = vmatprep.mubr.bf16.mxu0 %v1532_v33  ;;  %1346 = vadd.xlane.f32.xlu1 %v1345_v43 }
 0x2f2   : > { %v2752_v56 = vpop.eup %2751  ;;  %v1272_v58 = vmul.f32 1.442695, %v1224_v44  ;;  %v1274_v26 = vmul.f32 1.442695, %v1225_v59  ;;  %1682 = vmatmul.mubr.bf16.gmra.mxu0 %v1531_v32 }
 0x2f3   : > { %v1176_v46 = vpop.permute.xlu0 %1175  ;;  %v1348_v34 = vadd.f32 %v2752_v56, %v2750_v16 }
 0x2f4   : > { %2765 = vpow2.f32 %v1272_v58  ;;  %v1226_v48 = vsub.f32 %v3129_v63, %v1176_v46  ;;  %v1227_v35 = vsub.f32 %v3131_v0, %v1176_v46 }
 0x2f5   : > { %v2754_v25 = vpop.eup %2753  ;;  %2767 = vpow2.f32 %v1274_v26  ;;  %1349 = vadd.xlane.f32.xlu0 %v1348_v34 }
 0x2f6   : > { %v2756_v60 = vpop.eup %2755  ;;  %v1276_v61 = vmul.f32 1.442695, %v1226_v48  ;;  %v1278_v42 = vmul.f32 1.442695, %v1227_v35  ;;  %v1533_v37 = vpack.c.bf16 %v2754_v25, %v2750_v16 }
 0x2f7   : > { %v1181_v38 = vpop.permute.xlu1 %1180  ;;  %v1534_v50 = vpack.c.bf16 %v2756_v60, %v2752_v56  ;;  %v1351_v51 = vadd.f32 %v2756_v60, %v2754_v25 }
 0x2f8   : > { %2769 = vpow2.f32 %v1276_v61  ;;  %v1228_v10 = vsub.f32 %v3135_v2, %v1181_v38  ;;  %v1229_v22 = vsub.f32 %v3137_v3, %v1181_v38 }
 0x2f9   : > { %v2758_v30 = vpop.eup %2757  ;;  %2771 = vpow2.f32 %v1278_v42  ;;  %1689 = vmatprep.mubr.bf16.mxu0 %v1534_v50  ;;  %1352 = vadd.xlane.f32.xlu1 %v1351_v51 }
 0x2fa   : > { %v2760_v63 = vpop.eup %2759  ;;  %v1280_v0 = vmul.f32 1.442695, %v1228_v10  ;;  %v1282_v40 = vmul.f32 1.442695, %v1229_v22  ;;  %1690 = vmatmul.mubr.bf16.gmra.mxu0 %v1533_v37 }
 0x2fb   : > { %v1186_v49 = vpop.permute.xlu0 %1185  ;;  %v1354_v41 = vadd.f32 %v2760_v63, %v2758_v30 }
 0x2fc   : > { %2773 = vpow2.f32 %v1280_v0  ;;  %v1230_v53 = vsub.f32 %v3141_v5, %v1186_v49  ;;  %v1231_v54 = vsub.f32 %v3143_v6, %v1186_v49 }
 0x2fd   : > { %v2762_v57 = vpop.eup %2761  ;;  %2775 = vpow2.f32 %v1282_v40  ;;  %1355 = vadd.xlane.f32.xlu0 %v1354_v41 }
 0x2fe   : > { %v2764_v2 = vpop.eup %2763  ;;  %v1284_v3 = vmul.f32 1.442695, %v1230_v53  ;;  %v1286_v32 = vmul.f32 1.442695, %v1231_v54  ;;  %v1535_v13 = vpack.c.bf16 %v2762_v57, %v2758_v30 }
 0x2ff   : > { %v1191_v33 = vpop.permute.xlu1 %1190  ;;  %v1536_v43 = vpack.c.bf16 %v2764_v2, %v2760_v63  ;;  %v1357_v44 = vadd.f32 %v2764_v2, %v2762_v57 }
 0x300   : > { %2777 = vpow2.f32 %v1284_v3  ;;  %v1232_v59 = vsub.f32 %v3147_v8, %v1191_v33  ;;  %v1233_v16 = vsub.f32 %v3149_v9, %v1191_v33 }
 0x301   : > { %v2766_v56 = vpop.eup %2765  ;;  %2779 = vpow2.f32 %v1286_v32  ;;  %1697 = vmatprep.mubr.bf16.mxu0 %v1536_v43  ;;  %1358 = vadd.xlane.f32.xlu1 %v1357_v44 }
 0x302   : > { %v2768_v5 = vpop.eup %2767  ;;  %v1288_v6 = vmul.f32 1.442695, %v1232_v59  ;;  %v1290_v58 = vmul.f32 1.442695, %v1233_v16  ;;  %1698 = vmatmul.mubr.bf16.gmra.mxu0 %v1535_v13 }
 0x303   : > { %v1196_v26 = vpop.permute.xlu0 %1195  ;;  %v1360_v46 = vadd.f32 %v2768_v5, %v2766_v56 }
 0x304   : > { %2781 = vpow2.f32 %v1288_v6  ;;  %v1234_v34 = vsub.f32 %v3153_v11, %v1196_v26  ;;  %v1235_v48 = vsub.f32 %v3155_v12, %v1196_v26  ;;  %v3651_v26 = vsub.f32 %v3182_v29, %v3192_v36 }
 0x305   : > { %v2770_v35 = vpop.eup %2769  ;;  %2783 = vpow2.f32 %v1290_v58  ;;  %1361 = vadd.xlane.f32.xlu0 %v1360_v46  ;;  %v3655_v29 = vsub.f32 %v3218_v7, %v3228_v20  ;;  %v3659_v7 = vsub.f32 %v3262_v1, %v3270_v19 }
 0x306   : > { %v2772_v8 = vpop.eup %2771  ;;  %v1292_v9 = vmul.f32 1.442695, %v1234_v34  ;;  %v1294_v25 = vmul.f32 1.442695, %v1235_v48  ;;  %v1537_v60 = vpack.c.bf16 %v2770_v35, %v2766_v56  ;;  %v1098_v46 = vmul.f32 1.442695, %v3651_v26 }
 0x307   : > { %v1201_v61 = vpop.permute.xlu1 %1200  ;;  %v1363_v42 = vadd.f32 %v2772_v8, %v2770_v35  ;;  %v1538_v37 = vpack.c.bf16 %v2772_v8, %v2768_v5  ;;  %v3652_v34 = vsub.f32 %v3175_v24, %v3180_v28  ;;  %v3653_v35 = vsub.f32 %v3194_v39, %v3204_v52 }
 0x308   : > { %2785 = vpow2.f32 %v1292_v9  ;;  %v1236_v38 = vsub.f32 %v3159_v14, %v1201_v61  ;;  %v1237_v50 = vsub.f32 %v3161_v15, %v1201_v61  ;;  %v3654_v9 = vsub.f32 %v3206_v55, %v3216_v4 }
 0x309   : > { %v2774_v51 = vpop.eup %2773  ;;  %2787 = vpow2.f32 %v1294_v25  ;;  %1364 = vadd.xlane.f32.xlu1 %v1363_v42  ;;  %1705 = vmatprep.mubr.bf16.mxu0 %v1538_v37  ;;  %v1096_v48 = vmul.f32 1.442695, %v3652_v34  ;;  %v1100_v8 = vmul.f32 1.442695, %v3653_v35  ;;  %v1104_v36 = vmul.f32 1.442695, %v3655_v29 }
 0x30a   : > { %v2776_v11 = vpop.eup %2775  ;;  %v1296_v12 = vmul.f32 1.442695, %v1236_v38  ;;  %v1298_v10 = vmul.f32 1.442695, %v1237_v50  ;;  %1706 = vmatmul.mubr.bf16.gmra.mxu0 %v1537_v60  ;;  %v1102_v25 = vmul.f32 1.442695, %v3654_v9  ;;  %v3656_v24 = vsub.f32 %v3230_v21, %v3240_v27 }
 0x30b   : > { %v1206_v22 = vpop.permute.xlu0 %1205  ;;  %v1366_v30 = vadd.f32 %v2776_v11, %v2774_v51  ;;  %v3657_v39 = vsub.f32 %v3242_v31, %v3250_v45  ;;  %v3658_v55 = vsub.f32 %v3252_v47, %v3260_v62  ;;  %v1112_v20 = vmul.f32 1.442695, %v3659_v7  ;;  %v3660_v21 = vld [vmem:[#allocation6_spill] sm:$0xff]  ;;  %v3662_v31 = vld [vmem:[#allocation7_spill] sm:$0xff]  ;;  %v3663_v45 = vld [vmem:[#allocation8_spill] sm:$0xff] }
 0x30c   : > { %2789 = vpow2.f32 %v1296_v12  ;;  %v1238_v63 = vsub.f32 %v3165_v17, %v1206_v22  ;;  %v1239_v0 = vsub.f32 %v3167_v18, %v1206_v22  ;;  %v1106_v28 = vmul.f32 1.442695, %v3656_v24  ;;  %v3665_v38 = vld [vmem:[#allocation9_spill] sm:$0xff]  ;;  %v3666_v50 = vld [vmem:[#allocation10_spill] sm:$0xff]  ;;  %v1306_v29 = vld [vmem:[#allocation3 + $0x10] sm:$0xff] }
 0x30d   : > { %v2778_v40 = vpop.eup %2777  ;;  %2791 = vpow2.f32 %v1298_v10  ;;  %1367 = vadd.xlane.f32.xlu0 %v1366_v30  ;;  %v1108_v52 = vmul.f32 1.442695, %v3657_v39  ;;  %v1110_v4 = vmul.f32 1.442695, %v3658_v55  ;;  %v3661_v27 = vsub.f32 %v3272_v23, %v3660_v21  ;;  %v3668_v23 = vld [vmem:[#allocation11_spill] sm:$0xff]  ;;  %v3671_v30 = vld [vmem:[#allocation13_spill] sm:$0xff] }
 0x30e   : > { %v2780_v14 = vpop.eup %2779  ;;  %v1300_v15 = vmul.f32 1.442695, %v1238_v63  ;;  %v1302_v49 = vmul.f32 1.442695, %v1239_v0  ;;  %v1539_v41 = vpack.c.bf16 %v2778_v40, %v2774_v51  ;;  %v3664_v37 = vsub.f32 %v3662_v31, %v3663_v45  ;;  %v3672_v63 = vld [vmem:[#allocation14_spill] sm:$0xff]  ;;  %v1307_v39 = vld [vmem:[#allocation3 + $0x18] sm:$0xff] }
 0x30f   : > { %v1369_v53 = vadd.f32 %v2780_v14, %v2778_v40  ;;  %v1540_v54 = vpack.c.bf16 %v2780_v14, %v2776_v11  ;;  %v1114_v61 = vmul.f32 1.442695, %v3661_v27  ;;  %v3667_v1 = vsub.f32 %v3665_v38, %v3666_v50  ;;  %v3669_v11 = vld [vmem:[#allocation12_spill] sm:$0xff]  ;;  %v2728_v9 = vld [vmem:[%s3622_s4 + $0x20] sm:$0xff]   ;;  %v2729_v38 = vld [vmem:[%s3622_s4 + $0x18] sm:$0xff]  }
 0x310   : > { %2793 = vpow2.f32 %v1300_v15  ;;  %v1116_v47 = vmul.f32 1.442695, %v3664_v37  ;;  %v3670_v12 = vsub.f32 %v3668_v23, %v3669_v11  ;;  %v3673_v0 = vsub.f32 %v3671_v30, %v3672_v63  ;;  %v3674_v15 = vld [vmem:[#allocation15_spill] sm:$0xff]  ;;  %v1311_v11 = vld [vmem:[#allocation3 + $0x38] sm:$0xff] }
 0x311   : > { %v2782_v57 = vpop.eup %2781  ;;  %2795 = vpow2.f32 %v1302_v49  ;;  %1370 = vadd.xlane.f32.xlu1 %v1369_v53  ;;  %1713 = vmatprep.mubr.bf16.mxu0 %v1540_v54  ;;  %v1118_v19 = vmul.f32 1.442695, %v3667_v1  ;;  %v3675_v49 = vld [vmem:[#allocation16_spill] sm:$0xff] }
 0x312   : > { %v2784_v2 = vpop.eup %2783  ;;  %1714 = vmatmul.mubr.bf16.gmra.mxu0 %v1539_v41  ;;  %2797 = vpow2.f32 %v1098_v46  ;;  %v1120_v10 = vmul.f32 1.442695, %v3670_v12  ;;  %v1122_v40 = vmul.f32 1.442695, %v3673_v0  ;;  %v3676_v41 = vsub.f32 %v3674_v15, %v3675_v49  ;;  %v2727_v46 = vld [vmem:[%s3622_s4 + $0x28] sm:$0xff]   ;;  %v2730_v12 = vld [vmem:[%s3622_s4 + $0x10] sm:$0xff]  }
 0x313   : > { %v1372_v3 = vadd.f32 %v2784_v2, %v2782_v57  ;;  %2799 = vpow2.f32 %v1096_v48  ;;  %v1305_v48 = vld [vmem:[#allocation3 + $0x8] sm:$0xff] }
 0x314   : > { %2801 = vpow2.f32 %v1100_v8  ;;  %v1124_v53 = vmul.f32 1.442695, %v3676_v41 }
 0x315   : > { %v2786_v17 = vpop.eup %2785  ;;  %1373 = vadd.xlane.f32.xlu0 %v1372_v3  ;;  %2803 = vpow2.f32 %v1102_v25 }
 0x316   : > { %v2788_v18 = vpop.eup %2787  ;;  %v1541_v32 = vpack.c.bf16 %v2786_v17, %v2782_v57  ;;  %2805 = vpow2.f32 %v1104_v36  ;;  %v3677_v57 = vld [vmem:[#allocation17_spill] sm:$0xff] }
 0x317   : > { %v1375_v13 = vadd.f32 %v2788_v18, %v2786_v17  ;;  %v1542_v33 = vpack.c.bf16 %v2788_v18, %v2784_v2  ;;  %2807 = vpow2.f32 %v1106_v28  ;;  %v3678_v2 = vld [vmem:[#allocation18_spill] sm:$0xff] }
 0x318   : > { %2809 = vpow2.f32 %v1108_v52  ;;  %v3679_v3 = vsub.f32 %v3677_v57, %v3678_v2  ;;  %v1313_v57 = vld [vmem:[#allocation3 + $0x48] sm:$0xff]  ;;  %v2732_v2 = vld [vmem:[%s3622_s4] sm:$0xff]  }
 0x319   : > { %v2790_v43 = vpop.eup %2789  ;;  %1376 = vadd.xlane.f32.xlu1 %v1375_v13  ;;  %1721 = vmatprep.mubr.bf16.mxu1 %v1542_v33  ;;  %2811 = vpow2.f32 %v1110_v4 }
 0x31a   : > { %v2792_v44 = vpop.eup %2791  ;;  %1722 = vmatmul.mubr.bf16.vlgmr.msra.gmra.mxu1 %v1541_v32  ;;  %2813 = vpow2.f32 %v1112_v20  ;;  %v1126_v17 = vmul.f32 1.442695, %v3679_v3  ;;  %v1308_v20 = vld [vmem:[#allocation3 + $0x20] sm:$0xff] }
 0x31b   : > { %v1378_v59 = vadd.f32 %v2792_v44, %v2790_v43  ;;  %2815 = vpow2.f32 %v1114_v61 }
 0x31c   : > { %2817 = vpow2.f32 %v1116_v47 }
 0x31d   : > { %v2794_v16 = vpop.eup %2793  ;;  %1379 = vadd.xlane.f32.xlu0 %v1378_v59  ;;  %2819 = vpow2.f32 %v1118_v19 }
 0x31e   : > { %v2796_v56 = vpop.eup %2795  ;;  %v1543_v5 = vpack.c.bf16 %v2794_v16, %v2790_v43  ;;  %2821 = vpow2.f32 %v1120_v10 }
 0x31f   : > { %v1381_v6 = vadd.f32 %v2796_v56, %v2794_v16  ;;  %v1544_v58 = vpack.c.bf16 %v2796_v56, %v2792_v44  ;;  %v2798_v60 = vpop.eup %2797  ;;  %2823 = vpow2.f32 %v1122_v40  ;;  %v1312_v40 = vld [vmem:[#allocation3 + $0x40] sm:$0xff] }
 0x320   : > { %v2800_v42 = vpop.eup %2799  ;;  %2825 = vpow2.f32 %v1124_v53  ;;  %v1321_v8 = vmul.f32 %v2798_v60, %v1305_v48 }
 0x321   : > { %1382 = vadd.xlane.f32.xlu1 %v1381_v6  ;;  %1729 = vmatprep.mubr.bf16.mxu1 %v1544_v58  ;;  %v2802_v62 = vpop.eup %2801  ;;  %2827 = vpow2.f32 %v1126_v17  ;;  %v2726_v6 = vld [vmem:[%s3622_s4 + $0x30] sm:$0xff]   ;;  %v1304_v58 = vld [vmem:[#allocation3] sm:$0xff] }
 0x322   : > { %1730 = vmatmul.mubr.bf16.gmra.mxu1 %v1543_v5  ;;  %v3415_v51 = vpop.eup %2803  ;;  %v2725_v5 = vld [vmem:[%s3622_s4 + $0x38] sm:$0xff]   ;;  %v1320_v26 = vmul.f32 %v2800_v42, %v1304_v58  ;;  %v1322_v24 = vmul.f32 %v2802_v62, %v1306_v29 }
 0x323   : > { %v3421_v22 = vpop.eup %2805  ;;  %2584 = vmatprep.subr.bf16.mxu0 %v2725_v5  ;;  %v1323_v4 = vmul.f32 %v3415_v51, %v1307_v39 }
 0x324   : > { %v3426_v14 = vpop.eup %2807  ;;  %2585 = vmatpush3.bf16.msra.mxu0 %v2725_v5  ;;  %v1324_v27 = vmul.f32 %v3421_v22, %v1308_v20 }
 0x325   : > { %v3433_v54 = vpop.eup %2809  ;;  %2586 = vmatprep.subr.bf16.mxu0 %v2726_v6 }
 0x326   : > { %v3438_v18 = vpop.eup %2811 }
 0x327   : > { %v3442_v32 = vpop.eup %2813  ;;  %v1327_v30 = vmul.f32 %v3438_v18, %v1311_v11 }
 0x328   : > { %v3444_v13 = vpop.eup %2815  ;;  %2587 = vmatpush3.bf16.msra.mxu0 %v2726_v6  ;;  %v1328_v41 = vmul.f32 %v3442_v32, %v1312_v40  ;;  %v1314_v6 = vld [vmem:[#allocation3 + $0x50] sm:$0xff] }
 0x329   : > { %v3448_v33 = vpop.eup %2817  ;;  %2588 = vmatprep.subr.bf16.mxu0 %v2727_v46 }
 0x32a   : > { %v3450_v43 = vpop.eup %2819 }
 0x32b   : > { %v3454_v44 = vpop.eup %2821 }
 0x32c   : > { %v3456_v59 = vpop.eup %2823  ;;  %2589 = vmatpush3.bf16.msra.mxu0 %v2727_v46  ;;  %v1330_v46 = vmul.f32 %v3448_v33, %v1314_v6 }
 0x32d   : > { %v3460_v16 = vpop.eup %2825  ;;  %2590 = vmatprep.subr.bf16.mxu0 %v2728_v9 }
 0x32e   : > { %v3462_v56 = vpop.eup %2827 }
 0x330   : > { %2591 = vmatpush3.bf16.msra.mxu0 %v2728_v9 }
 0x331   : > { %2592 = vmatprep.subr.bf16.mxu0 %v2729_v38 }
 0x332   : > { %1440 = vperm.xlu1 %2676, %v2798_v60  }
 0x333   : > { %1435 = vperm.xlu0 %2675, %v2800_v42   ;;  %v1309_v42 = vld [vmem:[#allocation3 + $0x28] sm:$0xff] }
 0x334   : > { %v1325_v37 = vmul.f32 %v3426_v14, %v1309_v42  ;;  %2593 = vmatpush3.bf16.msra.mxu0 %v2729_v38 }
 0x335   : > { %2594 = vmatprep.subr.bf16.mxu0 %v2730_v12 }
 0x336   : > { %1445 = vperm.xlu1 %2676, %v2802_v62   ;;  %v1310_v62 = vld [vmem:[#allocation3 + $0x30] sm:$0xff] }
 0x337   : > { %1450 = vperm.xlu0 %2675, %v3415_v51   ;;  %v1326_v19 = vmul.f32 %v3433_v54, %v1310_v62 }
 0x338   : > { %2595 = vmatpush3.bf16.msra.mxu0 %v2730_v12 }
 0x33a   : > { %1455 = vperm.xlu1 %2676, %v3421_v22  }
 0x33b   : > { %1460 = vperm.xlu0 %2675, %v3426_v14   ;;  %v2731_v14 = vld [vmem:[%s3622_s4 + $0x8] sm:$0xff]  }
 0x33c   : > { %2596 = vmatprep.subr.bf16.mxu0 %v2731_v14 }
 0x33d   : > { %2597 = vmatpush3.bf16.msra.mxu0 %v2731_v14 }
 0x33e   : > { %1465 = vperm.xlu1 %2676, %v3433_v54   ;;  %2598 = vmatprep.subr.bf16.mxu0 %v2732_v2 }
 0x33f   : > { %1470 = vperm.xlu0 %2675, %v3438_v18   ;;  %v1329_v18 = vmul.f32 %v3444_v13, %v1313_v57 }
 0x341   : > { %2599 = vmatpush3.bf16.msra.mxu0 %v2732_v2 }
 0x342   : > { %1475 = vperm.xlu1 %2676, %v3442_v32  }
 0x343   : > { %1480 = vperm.xlu0 %2675, %v3444_v13  }
 0x346   : > { %1485 = vperm.xlu1 %2676, %v3448_v33  }
 0x347   : > { %1490 = vperm.xlu0 %2675, %v3450_v43  }
 0x34a   : > { %1495 = vperm.xlu1 %2676, %v3454_v44  }
 0x34b   : > { %1500 = vperm.xlu0 %2675, %v3456_v59  }
 0x34e   : > { %1505 = vperm.xlu1 %2676, %v3460_v16  }
 0x34f   : > { %1510 = vperm.xlu0 %2675, %v3462_v56  }
 0x36e   : > { %v1338_v34 = vpop.xlane.xlu1 %1337 }
 0x36f   : > { %v1384_v35 = vadd.f32 %v1338_v34, %v1320_v26 }
 0x371   : > { %1401 = vst.msk [vmem:[#allocation3] sm:$0xff] %vm342_vm0, %v1384_v35  ;;  %v1315_v35 = vld [vmem:[#allocation3 + $0x58] sm:$0xff] }
 0x372   : > { %v1341_v25 = vpop.xlane.xlu0 %1340  ;;  %v1331_v13 = vmul.f32 %v3450_v43, %v1315_v35 }
 0x373   : > { %v1385_v36 = vadd.f32 %v1341_v25, %v1321_v8 }
 0x375   : > { %1402 = vst.msk [vmem:[#allocation3 + $0x8] sm:$0xff] %vm342_vm0, %v1385_v36  ;;  %v1316_v36 = vld [vmem:[#allocation3 + $0x60] sm:$0xff] }
 0x376   : > { %v1344_v28 = vpop.xlane.xlu0 %1343  ;;  %v1332_v33 = vmul.f32 %v3454_v44, %v1316_v36 }
 0x377   : > { %v1386_v52 = vadd.f32 %v1344_v28, %v1322_v24 }
 0x378   : > { %v1805_v55 = vld [vmem:[#allocation3] sm:$0xff] }
 0x379   : > { %1403 = vst.msk [vmem:[#allocation3 + $0x10] sm:$0xff] %vm342_vm0, %v1386_v52  ;;  %2829 = vrcp.f32 %v1805_v55  ;;  %v1317_v55 = vld [vmem:[#allocation3 + $0x68] sm:$0xff] }
 0x37a   : > { %v1347_v7 = vpop.xlane.xlu1 %1346  ;;  %v1333_v43 = vmul.f32 %v3456_v59, %v1317_v55 }
 0x37b   : > { %v1387_v60 = vadd.f32 %v1347_v7, %v1323_v4 }
 0x37c   : > { %v1806_v21 = vld [vmem:[#allocation3 + $0x8] sm:$0xff] }
 0x37d   : > { %1404 = vst.msk [vmem:[#allocation3 + $0x18] sm:$0xff] %vm342_vm0, %v1387_v60  ;;  %2831 = vrcp.f32 %v1806_v21  ;;  %v1318_v21 = vld [vmem:[#allocation3 + $0x70] sm:$0xff] }
 0x37e   : > { %v1350_v61 = vpop.xlane.xlu0 %1349  ;;  %v1334_v44 = vmul.f32 %v3460_v16, %v1318_v21 }
 0x37f   : > { %v1388_v31 = vadd.f32 %v1350_v61, %v1324_v27 }
 0x380   : > { %v1807_v45 = vld [vmem:[#allocation3 + $0x10] sm:$0xff] }
 0x381   : > { %1405 = vst.msk [vmem:[#allocation3 + $0x20] sm:$0xff] %vm342_vm0, %v1388_v31  ;;  %2833 = vrcp.f32 %v1807_v45  ;;  %v1319_v45 = vld [vmem:[#allocation3 + $0x78] sm:$0xff] }
 0x382   : > { %v1353_v47 = vpop.xlane.xlu1 %1352  ;;  %v1335_v59 = vmul.f32 %v3462_v56, %v1319_v45 }
 0x383   : > { %v1389_v50 = vadd.f32 %v1353_v47, %v1325_v37 }
 0x384   : > { %v1808_v1 = vld [vmem:[#allocation3 + $0x18] sm:$0xff] }
 0x385   : > { %1406 = vst.msk [vmem:[#allocation3 + $0x28] sm:$0xff] %vm342_vm0, %v1389_v50  ;;  %2835 = vrcp.f32 %v1808_v1 }
 0x386   : > { %v2830_v51 = vpop.eup %2829  ;;  %v1356_v23 = vpop.xlane.xlu0 %1355 }
 0x387   : > { %v1390_v10 = vadd.f32 %v1356_v23, %v1326_v19  ;;  %1839 = vperm.xlu1 %2676, %v2830_v51  }
 0x388   : > { %v1809_v22 = vld [vmem:[#allocation3 + $0x20] sm:$0xff] }
 0x389   : > { %1407 = vst.msk [vmem:[#allocation3 + $0x30] sm:$0xff] %vm342_vm0, %v1390_v10  ;;  %2837 = vrcp.f32 %v1809_v22 }
 0x38a   : > { %v2832_v63 = vpop.eup %2831  ;;  %v1359_v0 = vpop.xlane.xlu1 %1358 }
 0x38b   : > { %v1391_v15 = vadd.f32 %v1359_v0, %v1327_v30  ;;  %1844 = vperm.xlu0 %2675, %v2832_v63  }
 0x38c   : > { %v1810_v49 = vld [vmem:[#allocation3 + $0x28] sm:$0xff] }
 0x38d   : > { %1408 = vst.msk [vmem:[#allocation3 + $0x38] sm:$0xff] %vm342_vm0, %v1391_v15  ;;  %2839 = vrcp.f32 %v1810_v49 }
 0x38e   : > { %v2834_v53 = vpop.eup %2833  ;;  %v1362_v54 = vpop.xlane.xlu0 %1361 }
 0x38f   : > { %v1392_v3 = vadd.f32 %v1362_v54, %v1328_v41  ;;  %1849 = vperm.xlu1 %2676, %v2834_v53  }
 0x390   : > { %v1811_v17 = vld [vmem:[#allocation3 + $0x30] sm:$0xff] }
 0x391   : > { %1409 = vst.msk [vmem:[#allocation3 + $0x40] sm:$0xff] %vm342_vm0, %v1392_v3  ;;  %2841 = vrcp.f32 %v1811_v17 }
 0x392   : > { %v2836_v32 = vpop.eup %2835  ;;  %v1365_v5 = vpop.xlane.xlu1 %1364 }
 0x393   : > { %v1393_v58 = vadd.f32 %v1365_v5, %v1329_v18  ;;  %1854 = vperm.xlu0 %2675, %v2836_v32  }
 0x394   : > { %v1812_v26 = vld [vmem:[#allocation3 + $0x38] sm:$0xff] }
 0x395   : > { %1410 = vst.msk [vmem:[#allocation3 + $0x48] sm:$0xff] %vm342_vm0, %v1393_v58  ;;  %2843 = vrcp.f32 %v1812_v26 }
 0x396   : > { %v2838_v34 = vpop.eup %2837  ;;  %v1368_v48 = vpop.xlane.xlu0 %1367 }
 0x397   : > { %v1394_v8 = vadd.f32 %v1368_v48, %v1330_v46  ;;  %1859 = vperm.xlu1 %2676, %v2838_v34  }
 0x398   : > { %v1813_v9 = vld [vmem:[#allocation3 + $0x40] sm:$0xff] }
 0x399   : > { %1411 = vst.msk [vmem:[#allocation3 + $0x50] sm:$0xff] %vm342_vm0, %v1394_v8  ;;  %2845 = vrcp.f32 %v1813_v9 }
 0x39a   : > { %v2840_v25 = vpop.eup %2839  ;;  %v1371_v29 = vpop.xlane.xlu1 %1370 }
 0x39b   : > { %v1395_v24 = vadd.f32 %v1371_v29, %v1331_v13  ;;  %1864 = vperm.xlu0 %2675, %v2840_v25  }
 0x39c   : > { %v1814_v28 = vld [vmem:[#allocation3 + $0x48] sm:$0xff] }
 0x39d   : > { %1412 = vst.msk [vmem:[#allocation3 + $0x58] sm:$0xff] %vm342_vm0, %v1395_v24  ;;  %2847 = vrcp.f32 %v1814_v28 }
 0x39e   : > { %v2842_v39 = vpop.eup %2841  ;;  %v1374_v52 = vpop.xlane.xlu0 %1373 }
 0x39f   : > { %v1396_v4 = vadd.f32 %v1374_v52, %v1332_v33  ;;  %1869 = vperm.xlu1 %2676, %v2842_v39  }
 0x3a0   : > { %v1815_v7 = vld [vmem:[#allocation3 + $0x50] sm:$0xff] }
 0x3a1   : > { %1413 = vst.msk [vmem:[#allocation3 + $0x60] sm:$0xff] %vm342_vm0, %v1396_v4  ;;  %2849 = vrcp.f32 %v1815_v7 }
 0x3a2   : > { %v2844_v20 = vpop.eup %2843  ;;  %v1377_v60 = vpop.xlane.xlu1 %1376 }
 0x3a3   : > { %v1397_v27 = vadd.f32 %v1377_v60, %v1333_v43  ;;  %1874 = vperm.xlu0 %2675, %v2844_v20  }
 0x3a4   : > { %v1816_v61 = vld [vmem:[#allocation3 + $0x58] sm:$0xff] }
 0x3a5   : > { %1414 = vst.msk [vmem:[#allocation3 + $0x68] sm:$0xff] %vm342_vm0, %v1397_v27  ;;  %2851 = vrcp.f32 %v1816_v61 }
 0x3a6   : > { %v2846_v42 = vpop.eup %2845  ;;  %v1380_v31 = vpop.xlane.xlu0 %1379 }
 0x3a7   : > { %v1398_v37 = vadd.f32 %v1380_v31, %v1334_v44  ;;  %1879 = vperm.xlu1 %2676, %v2846_v42  }
 0x3a8   : > { %v1817_v47 = vld [vmem:[#allocation3 + $0x60] sm:$0xff] }
 0x3a9   : > { %1415 = vst.msk [vmem:[#allocation3 + $0x70] sm:$0xff] %vm342_vm0, %v1398_v37  ;;  %2853 = vrcp.f32 %v1817_v47 }
 0x3aa   : > { %v2848_v62 = vpop.eup %2847  ;;  %v1383_v38 = vpop.xlane.xlu1 %1382 }
 0x3ab   : > { %v1399_v50 = vadd.f32 %v1383_v38, %v1335_v59  ;;  %1884 = vperm.xlu0 %2675, %v2848_v62   ;;  %v2488_v22 = vpop.f32.mrf.mxu0 }
 0x3ac   : > { %v1818_v1 = vld [vmem:[#allocation3 + $0x68] sm:$0xff] }
 0x3ad   : > { %1416 = vst.msk [vmem:[#allocation3 + $0x78] sm:$0xff] %vm342_vm0, %v1399_v50  ;;  %2855 = vrcp.f32 %v1818_v1  ;;  %v2489_v30 = vpop.f32.mrf.mxu0 }
 0x3ae   : > { %v2850_v16 = vpop.eup %2849  ;;  %v1441_v40 = vpop.permute.xlu1 %1440  ;;  %v2490_v33 = vadd.f32 %v2489_v30, %v2488_v22 }
 0x3af   : > { %1889 = vperm.xlu1 %2676, %v2850_v16   ;;  %v2491_v63 = vpop.f32.mrf.mxu0  ;;  %v1436_v14 = vpop.permute.xlu0 %1435  ;;  %v1514_v39 = vmul.f32 0.0, %v1441_v40 }
 0x3b0   : > { %v1819_v19 = vld [vmem:[#allocation3 + $0x70] sm:$0xff]  ;;  %v1513_v29 = vmul.f32 0.0, %v1436_v14 }
 0x3b1   : > { %2857 = vrcp.f32 %v1819_v19  ;;  %v2492_v0 = vpop.f32.mrf.mxu0 }
 0x3b2   : > { %v2852_v51 = vpop.eup %2851  ;;  %v1446_v49 = vpop.permute.xlu1 %1445  ;;  %v2493_v36 = vadd.f32 %v2492_v0, %v2491_v63  ;;  %v1738_v4 = vadd.f32 %v2490_v33, %v1513_v29 }
 0x3b3   : > { %1894 = vperm.xlu0 %2675, %v2852_v51   ;;  %v2494_v15 = vpop.f32.mrf.mxu0  ;;  %v1451_v53 = vpop.permute.xlu0 %1450  ;;  %v1515_v31 = vmul.f32 0.0, %v1446_v49 }
 0x3b4   : > { %v1820_v23 = vld [vmem:[#allocation3 + $0x78] sm:$0xff]  ;;  %v1739_v7 = vadd.f32 %v2493_v36, %v1514_v39  ;;  %v1516_v42 = vmul.f32 0.0, %v1451_v53 }
 0x3b5   : > { %2859 = vrcp.f32 %v1820_v23  ;;  %v2495_v41 = vpop.f32.mrf.mxu0 }
 0x3b6   : > { %v2854_v11 = vpop.eup %2853  ;;  %v1456_v57 = vpop.permute.xlu1 %1455  ;;  %v2496_v21 = vadd.f32 %v2495_v41, %v2494_v15 }
 0x3b7   : > { %1899 = vperm.xlu1 %2676, %v2854_v11   ;;  %v2497_v54 = vpop.f32.mrf.mxu0  ;;  %v1461_v2 = vpop.permute.xlu0 %1460  ;;  %v1517_v11 = vmul.f32 0.0, %v1456_v57 }
 0x3b8   : > { %v1740_v47 = vadd.f32 %v2496_v21, %v1515_v31  ;;  %v1518_v23 = vmul.f32 0.0, %v1461_v2 }
 0x3b9   : > { %v2498_v3 = vpop.f32.mrf.mxu0 }
 0x3ba   : > { %v2856_v56 = vpop.eup %2855  ;;  %v1466_v17 = vpop.permute.xlu1 %1465  ;;  %v2499_v27 = vadd.f32 %v2498_v3, %v2497_v54 }
 0x3bb   : > { %1904 = vperm.xlu0 %2675, %v2856_v56   ;;  %v2500_v18 = vpop.f32.mrf.mxu0  ;;  %v1471_v32 = vpop.permute.xlu0 %1470  ;;  %v1519_v54 = vmul.f32 0.0, %v1466_v17 }
 0x3bc   : > { %v1741_v59 = vadd.f32 %v2499_v27, %v1516_v42  ;;  %v1520_v53 = vmul.f32 0.0, %v1471_v32 }
 0x3bd   : > { %v2501_v5 = vpop.f32.mrf.mxu0 }
 0x3be   : > { %v2858_v12 = vpop.eup %2857  ;;  %v3519_v6 = vpop.permute.xlu1 %1475  ;;  %v2502_v1 = vadd.f32 %v2501_v5, %v2500_v18 }
 0x3bf   : > { %1909 = vperm.xlu1 %2676, %v2858_v12   ;;  %v3521_v58 = vpop.permute.xlu0 %1480  ;;  %v2503_v26 = vpop.f32.mrf.mxu0 }
 0x3c1   : > { %v2504_v34 = vpop.f32.mrf.mxu0 }
 0x3c2   : > { %v2860_v10 = vpop.eup %2859  ;;  %v3523_v46 = vpop.permute.xlu1 %1485  ;;  %v2505_v16 = vadd.f32 %v2504_v34, %v2503_v26 }
 0x3c3   : > { %1914 = vperm.xlu0 %2675, %v2860_v10   ;;  %v3525_v48 = vpop.permute.xlu0 %1490  ;;  %v2506_v35 = vpop.f32.mrf.mxu0  ;;  %v1742_v10 = vadd.f32 %v2502_v1, %v1517_v11  ;;  %v1523_v31 = vmul.f32 0.0, %v3523_v46 }
 0x3c4   : > { %v1743_v22 = vadd.f32 %v2505_v16, %v1518_v23  ;;  %v1524_v42 = vmul.f32 0.0, %v3525_v48 }
 0x3c5   : > { %v2507_v13 = vpop.f32.mrf.mxu0 }
 0x3c6   : > { %v3527_v8 = vpop.permute.xlu1 %1495  ;;  %v2508_v40 = vadd.f32 %v2507_v13, %v2506_v35  ;;  %v1522_v13 = vmul.f32 0.0, %v3521_v58 }
 0x3c7   : > { %v3529_v9 = vpop.permute.xlu0 %1500  ;;  %v2509_v24 = vpop.f32.mrf.mxu0 }
 0x3c8   : > { %v1744_v2 = vadd.f32 %v2508_v40, %v1519_v54  ;;  %v3546_v54 = vld [vmem:[%s3623_s5] ss:$0 sm:$0xff] }
 0x3c9   : > { %v2510_v55 = vpop.f32.mrf.mxu0 }
 0x3ca   : > { %v3531_v25 = vpop.permute.xlu1 %1505  ;;  %v2511_v14 = vadd.f32 %v2510_v55, %v2509_v24  ;;  %v1521_v24 = vmul.f32 0.0, %v3519_v6 }
 0x3cb   : > { %v3533_v28 = vpop.permute.xlu0 %1510  ;;  %v2512_v61 = vpop.f32.mrf.mxu0  ;;  %v1527_v40 = vmul.f32 0.0, %v3531_v25 }
 0x3cc   : > { %v1745_v57 = vadd.f32 %v2511_v14, %v1520_v53 }
 0x3cd   : > { %v2513_v37 = vpop.f32.mrf.mxu0 }
 0x3ce   : > { %v2514_v36 = vadd.f32 %v2513_v37, %v2512_v61 }
 0x3cf   : > { %v2515_v19 = vpop.f32.mrf.mxu0 }
 0x3d0   : > { %v1746_v55 = vadd.f32 %v2514_v36, %v1521_v24 }
 0x3d1   : > { %v2516_v12 = vpop.f32.mrf.mxu0 }
 0x3d2   : > { %v2517_v33 = vadd.f32 %v2516_v12, %v2515_v19  ;;  %v1526_v19 = vmul.f32 0.0, %v3529_v9 }
 0x3d3   : > { %v2518_v15 = vpop.f32.mrf.mxu0 }
 0x3d5   : > { %v2519_v18 = vpop.f32.mrf.mxu0 }
 0x3d6   : > { %v2520_v21 = vadd.f32 %v2519_v18, %v2518_v15 }
 0x3d7   : > { %v2521_v39 = vpop.f32.mrf.mxu0 }
 0x3d8   : > { %v1748_v6 = vadd.f32 %v2520_v21, %v1523_v31 }
 0x3d9   : > { %v2522_v32 = vpop.f32.mrf.mxu0 }
 0x3da   : > { %v2524_v41 = vpop.f32.mrf.mxu1  ;;  %v2523_v27 = vadd.f32 %v2522_v32, %v2521_v39  ;;  %v2110_v39 = vld [vmem:[%s2994_s22 + $0x8] sm:$0xff] }
 0x3dc   : > { %v2525_v5 = vpop.f32.mrf.mxu1 }
 0x3de   : > { %v2527_v35 = vpop.f32.mrf.mxu1 }
 0x402   : > { %v1840_v52 = vpop.permute.xlu1 %1839 }
 0x403   : > { %v1917_v20 = vmul.f32 %v1840_v52, %v1738_v4  ;;  %v1747_v4 = vadd.f32 %v2517_v33, %v1522_v13 }
 0x406   : > { %v1845_v43 = vpop.permute.xlu0 %1844 }
 0x407   : > { %v1918_v60 = vmul.f32 %v1845_v43, %v1739_v7  ;;  %v2528_v7 = vpop.f32.mrf.mxu1 }
 0x409   : > { %v1933_v44 = vpack.c.bf16 %v1918_v60, %v1917_v20 }
 0x40a   : > { %v1850_v45 = vpop.permute.xlu1 %1849 }
 0x40b   : > { %2600 = vmatprep.mubr.bf16.mxu0 %v1933_v44  ;;  %v1919_v38 = vmul.f32 %v1850_v45, %v1740_v47  ;;  %v2530_v44 = vpop.f32.mrf.mxu1  ;;  %v1749_v45 = vadd.f32 %v2523_v27, %v1524_v42 }
 0x40d   : > { %v2531_v37 = vpop.f32.mrf.mxu1 }
 0x40e   : > { %v1855_v62 = vpop.permute.xlu0 %1854 }
 0x40f   : > { %v1920_v50 = vmul.f32 %v1855_v62, %v1741_v59  ;;  %v2533_v16 = vpop.f32.mrf.mxu1 }
 0x411   : > { %v1934_v51 = vpack.c.bf16 %v1920_v50, %v1919_v38  ;;  %v2526_v38 = vadd.f32 %v2525_v5, %v2524_v41  ;;  %v2529_v50 = vadd.f32 %v2528_v7, %v2527_v35  ;;  %v2534_v11 = vpop.f32.mrf.mxu1 }
 0x412   : > { %v1860_v56 = vpop.permute.xlu1 %1859 }
 0x413   : > { %2601 = vmatmul.mubr.bf16.vlgmr.msra.gmra.mxu0 %v1934_v51  ;;  %v1921_v63 = vmul.f32 %v1860_v56, %v1742_v10  ;;  %v1525_v51 = vmul.f32 0.0, %v3527_v8  ;;  %v1751_v46 = vadd.f32 %v2529_v50, %v1526_v19 }
 0x415   : > { %v1750_v23 = vadd.f32 %v2526_v38, %v1525_v51 }
 0x416   : > { %v1865_v30 = vpop.permute.xlu0 %1864 }
 0x417   : > { %v1922_v0 = vmul.f32 %v1865_v30, %v1743_v22  ;;  %v2532_v22 = vadd.f32 %v2531_v37, %v2530_v44  ;;  %v2535_v30 = vadd.f32 %v2534_v11, %v2533_v16  ;;  %v2114_v44 = vld [vmem:[%s2994_s22 + $0x28] sm:$0xff] }
 0x419   : > { %v1935_v49 = vpack.c.bf16 %v1922_v0, %v1921_v63  ;;  %v1528_v0 = vmul.f32 0.0, %v3533_v28  ;;  %v1752_v9 = vadd.f32 %v2532_v22, %v1527_v40 }
 0x41a   : > { %v1870_v3 = vpop.permute.xlu1 %1869 }
 0x41b   : > { %2604 = vmatprep.mubr.bf16.mxu0 %v1935_v49  ;;  %v1923_v34 = vmul.f32 %v1870_v3, %v1744_v2  ;;  %v1753_v14 = vadd.f32 %v2535_v30, %v1528_v0  ;;  %v2111_v3 = vld [vmem:[%s2994_s22 + $0x10] sm:$0xff]  ;;  %v2109_v2 = vld [vmem:[%s2994_s22] sm:$0xff] }
 0x41c   : > { %v2121_v30 = vld [vmem:[%s2994_s22 + $0x60] sm:$0xff] }
 0x41e   : > { %v1875_v26 = vpop.permute.xlu0 %1874 }
 0x41f   : > { %v1924_v29 = vmul.f32 %v1875_v26, %v1745_v57 }
 0x421   : > { %v1936_v52 = vpack.c.bf16 %v1924_v29, %v1923_v34  ;;  %v2112_v34 = vld [vmem:[%s2994_s22 + $0x18] sm:$0xff] }
 0x422   : > { %v1880_v17 = vpop.permute.xlu1 %1879 }
 0x423   : > { %2605 = vmatmul.mubr.bf16.gmra.mxu0 %v1936_v52  ;;  %v1925_v20 = vmul.f32 %v1880_v17, %v1746_v55  ;;  %v2115_v17 = vld [vmem:[%s2994_s22 + $0x30] sm:$0xff] }
 0x426   : > { %v1885_v43 = vpop.permute.xlu0 %1884 }
 0x427   : > { %v1926_v60 = vmul.f32 %v1885_v43, %v1747_v4  ;;  %v2113_v4 = vld [vmem:[%s2994_s22 + $0x20] sm:$0xff] }
 0x429   : > { %v1937_v61 = vpack.c.bf16 %v1926_v60, %v1925_v20  ;;  %v2116_v60 = vld [vmem:[%s2994_s22 + $0x38] sm:$0xff] }
 0x42a   : > { %v1890_v58 = vpop.permute.xlu1 %1889 }
 0x42b   : > { %2608 = vmatprep.mubr.bf16.mxu0 %v1937_v61  ;;  %v1927_v59 = vmul.f32 %v1890_v58, %v1748_v6 }
 0x42e   : > { %v1895_v47 = vpop.permute.xlu0 %1894 }
 0x42f   : > { %v1928_v62 = vmul.f32 %v1895_v47, %v1749_v45  ;;  %v2119_v45 = vld [vmem:[%s2994_s22 + $0x50] sm:$0xff] }
 0x431   : > { %v1938_v1 = vpack.c.bf16 %v1928_v62, %v1927_v59  ;;  %v2117_v59 = vld [vmem:[%s2994_s22 + $0x40] sm:$0xff] }
 0x432   : > { %v1900_v48 = vpop.permute.xlu1 %1899 }
 0x433   : > { %2609 = vmatmul.mubr.bf16.gmra.mxu0 %v1938_v1  ;;  %v1929_v12 = vmul.f32 %v1900_v48, %v1750_v23  ;;  %v2120_v1 = vld [vmem:[%s2994_s22 + $0x58] sm:$0xff]  ;;  %v2118_v48 = vld [vmem:[%s2994_s22 + $0x48] sm:$0xff] }
 0x436   : > { %v1905_v56 = vpop.permute.xlu0 %1904 }
 0x437   : > { %v1930_v10 = vmul.f32 %v1905_v56, %v1751_v46 }
 0x439   : > { %v1939_v63 = vpack.c.bf16 %v1930_v10, %v1929_v12  ;;  %v2123_v12 = vld [vmem:[%s2994_s22 + $0x70] sm:$0xff] }
 0x43a   : > { %v1910_v8 = vpop.permute.xlu1 %1909 }
 0x43b   : > { %2612 = vmatprep.mubr.bf16.mxu0 %v1939_v63  ;;  %v1931_v49 = vmul.f32 %v1910_v8, %v1752_v9  ;;  %v2124_v8 = vld [vmem:[%s2994_s22 + $0x78] sm:$0xff] }
 0x43e   : > { %v1915_v15 = vpop.permute.xlu0 %1914 }
 0x43f   : > { %v1932_v41 = vmul.f32 %v1915_v15, %v1753_v14 }
 0x441   : > { %v1940_v53 = vpack.c.bf16 %v1932_v41, %v1931_v49  ;;  %v2122_v49 = vld [vmem:[%s2994_s22 + $0x68] sm:$0xff] }
 0x443   : > { %2613 = vmatmul.mubr.bf16.gmra.mxu0 %v1940_v53 }
 0x4d3   : > { %v2602_v28 = vpop.f32.mrf.mxu0 }
 0x4d4   : > { %v2055_v25 = vadd.f32 %v2602_v28, %v3546_v54 }
 0x4d5   : > { %v2046_v18 = vpop.f32.mrf.mxu0 }
 0x4d6   : > { %v2127_v57 = vadd.f32 %v2111_v3, %v2055_v25  ;;  %v2047_v5 = vadd.f32 %v3546_v54, %v2046_v18 }
 0x4d7   : > { %v2603_v26 = vpop.f32.mrf.mxu0 }
 0x4d8   : > { %2143 = vst [vmem:[%s3555_s20 + $0x10] sm:$0xff] %v2127_v57  ;;  %v2125_v29 = vadd.f32 %v2109_v2, %v2047_v5  ;;  %v2058_v36 = vadd.f32 %v2603_v26, %v3546_v54 }
 0x4d9   : > { %v2049_v33 = vpop.f32.mrf.mxu0 }
 0x4da   : > { %2141 = vst [vmem:[%s3555_s20] sm:$0xff] %v2125_v29  ;;  %v2128_v52 = vadd.f32 %v2112_v34, %v2058_v36  ;;  %v2050_v35 = vadd.f32 %v3546_v54, %v2049_v33 }
 0x4dc   : > { %2144 = vst [vmem:[%s3555_s20 + $0x18] sm:$0xff] %v2128_v52  ;;  %v2126_v13 = vadd.f32 %v2110_v39, %v2050_v35 }
 0x4de   : > { %2142 = vst [vmem:[%s3555_s20 + $0x8] sm:$0xff] %v2126_v13 }
 0x4e3   : > { %v2606_v24 = vpop.f32.mrf.mxu0 }
 0x4e4   : > { %v2071_v32 = vadd.f32 %v2606_v24, %v3546_v54 }
 0x4e5   : > { %v2062_v55 = vpop.f32.mrf.mxu0 }
 0x4e6   : > { %v2131_v7 = vadd.f32 %v2115_v17, %v2071_v32  ;;  %v2063_v43 = vadd.f32 %v3546_v54, %v2062_v55 }
 0x4e7   : > { %v2607_v20 = vpop.f32.mrf.mxu0 }
 0x4e8   : > { %2147 = vst [vmem:[%s3555_s20 + $0x30] sm:$0xff] %v2131_v7  ;;  %v2129_v21 = vadd.f32 %v2113_v4, %v2063_v43  ;;  %v2074_v27 = vadd.f32 %v2607_v20, %v3546_v54 }
 0x4e9   : > { %v2065_v61 = vpop.f32.mrf.mxu0 }
 0x4ea   : > { %2145 = vst [vmem:[%s3555_s20 + $0x20] sm:$0xff] %v2129_v21  ;;  %v2132_v42 = vadd.f32 %v2116_v60, %v2074_v27  ;;  %v2066_v31 = vadd.f32 %v3546_v54, %v2065_v61 }
 0x4ec   : > { %2148 = vst [vmem:[%s3555_s20 + $0x38] sm:$0xff] %v2132_v42  ;;  %v2130_v58 = vadd.f32 %v2114_v44, %v2066_v31 }
 0x4ee   : > { %2146 = vst [vmem:[%s3555_s20 + $0x28] sm:$0xff] %v2130_v58 }
 0x4f3   : > { %v2610_v6 = vpop.f32.mrf.mxu0 }
 0x4f4   : > { %v2087_v37 = vadd.f32 %v2610_v6, %v3546_v54 }
 0x4f5   : > { %v2078_v47 = vpop.f32.mrf.mxu0 }
 0x4f6   : > { %v2135_v62 = vadd.f32 %v2119_v45, %v2087_v37  ;;  %v2079_v38 = vadd.f32 %v3546_v54, %v2078_v47 }
 0x4f7   : > { %v2611_v50 = vpop.f32.mrf.mxu0 }
 0x4f8   : > { %2151 = vst [vmem:[%s3555_s20 + $0x50] sm:$0xff] %v2135_v62  ;;  %v2133_v16 = vadd.f32 %v2117_v59, %v2079_v38  ;;  %v2090_v19 = vadd.f32 %v2611_v50, %v3546_v54 }
 0x4f9   : > { %v2081_v51 = vpop.f32.mrf.mxu0 }
 0x4fa   : > { %2149 = vst [vmem:[%s3555_s20 + $0x40] sm:$0xff] %v2133_v16  ;;  %v2136_v23 = vadd.f32 %v2120_v1, %v2090_v19  ;;  %v2082_v46 = vadd.f32 %v3546_v54, %v2081_v51 }
 0x4fc   : > { %2152 = vst [vmem:[%s3555_s20 + $0x58] sm:$0xff] %v2136_v23  ;;  %v2134_v11 = vadd.f32 %v2118_v48, %v2082_v46 }
 0x4fe   : > { %2150 = vst [vmem:[%s3555_s20 + $0x48] sm:$0xff] %v2134_v11 }
 0x503   : > { %v2614_v56 = vpop.f32.mrf.mxu0 }
 0x504   : > { %v2103_v10 = vadd.f32 %v2614_v56, %v3546_v54 }
 0x505   : > { %v2094_v22 = vpop.f32.mrf.mxu0 }
 0x506   : > { %v2139_v63 = vadd.f32 %v2123_v12, %v2103_v10  ;;  %v2095_v0 = vadd.f32 %v3546_v54, %v2094_v22 }
 0x507   : > { %v2615_v40 = vpop.f32.mrf.mxu0 }
 0x508   : > { %2155 = vst [vmem:[%s3555_s20 + $0x70] sm:$0xff] %v2139_v63  ;;  %v2137_v9 = vadd.f32 %v2121_v30, %v2095_v0  ;;  %v2106_v14 = vadd.f32 %v2615_v40, %v3546_v54 }
 0x509   : > { %v2097_v15 = vpop.f32.mrf.mxu0 }
 0x50a   : > { %2153 = vst [vmem:[%s3555_s20 + $0x60] sm:$0xff] %v2137_v9  ;;  %v2140_v41 = vadd.f32 %v2124_v8, %v2106_v14  ;;  %v2098_v53 = vadd.f32 %v3546_v54, %v2097_v15 }
 0x50c   : > { %2156 = vst [vmem:[%s3555_s20 + $0x78] sm:$0xff] %v2140_v41  ;;  %v2138_v28 = vadd.f32 %v2122_v49, %v2098_v53 }
 0x50e   : > { %2154 = vst [vmem:[%s3555_s20 + $0x68] sm:$0xff] %v2138_v28 }
 0x50f PF: > { %s16_s25 = sadd.s32 1, %s2899_s25   ;;  %s3680_s21 = smov %s2891_s23 }
 0x510   : > { %p13_p7 = scmp.ge.s32.totalorder %s16_s25, 6   ;;  %s3681_s22 = smov %s2895_s24 }
 0x511   : > { %s3682_s23 = smov %s3685_s26  ;;  %s3683_s24 = smov %s3689_s27 }
 0x512   :  { %15 = sbr.rel (!%p13_p7) target bundleno = 3 (0x3), region = 85 }

</bundles_post_ra>
